<compile_context>
chip_gen: v7x
topology: tpu7x:2x2x1
jax: 0.10.0
libtpu: 0.0.40
codegen_flags: <defaults>
</compile_context>

<pallas_src>
import math
import functools

import jax
import jax.numpy as jnp
from jax import lax
from jax.experimental import pallas as pl
from jax.experimental.pallas import tpu as pltpu


def _layernorm(x, gamma, beta, eps=1e-5):
    # x: [R, D], gamma/beta: [1, D]; biased variance, matching nn.LayerNorm.
    mean = jnp.mean(x, axis=-1, keepdims=True)
    var = jnp.mean((x - mean) ** 2, axis=-1, keepdims=True)
    return (x - mean) * lax.rsqrt(var + eps) * gamma + beta


def transformer_kernel(x_ref,
                       ln1_g_ref, ln1_b_ref,
                       wqkv_ref, bqkv_ref,
                       wo_ref, bo_ref,
                       ln2_g_ref, ln2_b_ref,
                       w1_ref, b1_ref, w2_ref, b2_ref,
                       o_ref,
                       *, n_heads):
    Bb, T, D = x_ref.shape
    Dh = D // n_heads
    scale = 1.0 / math.sqrt(Dh)

    # Flatten (Bb, T) rows into one 2-D slab for LN / projections / MLP.
    x = x_ref[...].astype(jnp.float32).reshape(Bb * T, D)            # [R, D]

    # ----- ln_1 -----
    h = _layernorm(x, ln1_g_ref[...], ln1_b_ref[...])                # [R, D] f32

    # ----- fused QKV projection: one [D, 3D] matmul (bf16 in, f32 acc) -----
    qkv = jnp.dot(h.astype(jnp.bfloat16), wqkv_ref[...],
                  preferred_element_type=jnp.float32) + bqkv_ref[...]   # [R, 3D]
    qkv = qkv.reshape(Bb, T, 3 * D)
    q = qkv[:, :, 0 * D:1 * D].astype(jnp.bfloat16)                  # [Bb, T, D]
    k = qkv[:, :, 1 * D:2 * D].astype(jnp.bfloat16)
    v = qkv[:, :, 2 * D:3 * D].astype(jnp.bfloat16)

    # Additive causal mask (strict upper triangle -> -inf), hoisted out of head loop.
    row = lax.broadcasted_iota(jnp.int32, (1, T, T), 1)
    col = lax.broadcasted_iota(jnp.int32, (1, T, T), 2)
    mask_bias = jnp.where(col > row, jnp.float32(-jnp.inf), jnp.float32(0.0))

    # ----- masked multi-head attention, batched over Bb via 3-D einsums -----
    # TODO(synk): for large T switch to an online-softmax (flash) formulation with
    # KV tiles instead of materializing the full [T, T] scores.
    ctx_heads = []
    for hd in range(n_heads):                     # small static loop over heads
        sl = slice(hd * Dh, (hd + 1) * Dh)
        s = jnp.einsum('bqd,bkd->bqk', q[:, :, sl], k[:, :, sl],
                       preferred_element_type=jnp.float32)           # [Bb, T, T]
        s = s * scale + mask_bias
        m = jnp.max(s, axis=-1, keepdims=True)
        p = jnp.exp(s - m)
        denom = jnp.sum(p, axis=-1, keepdims=True)
        p = p * pl.reciprocal(denom, approx=True)                    # softmax
        ctx_heads.append(jnp.einsum('bqk,bkd->bqd', p.astype(jnp.bfloat16),
                                    v[:, :, sl],
                                    preferred_element_type=jnp.float32))
    ctx = jnp.concatenate(ctx_heads, axis=-1).reshape(Bb * T, D)     # [R, D]

    attn = jnp.dot(ctx.astype(jnp.bfloat16), wo_ref[...],
                   preferred_element_type=jnp.float32) + bo_ref[...]

    # TODO(synk): dropout_1 / attention dropout / dropout_2 are identity here
    # (inference semantics); PyTorch training-mode dropout RNG is not reproduced.
    x1 = attn + x                                                    # residual 1

    # ----- ln_2 + MLP (exact erf GELU) -----
    h2 = _layernorm(x1, ln2_g_ref[...], ln2_b_ref[...])
    f = jnp.dot(h2.astype(jnp.bfloat16), w1_ref[...],
                preferred_element_type=jnp.float32) + b1_ref[...]
    f = 0.5 * f * (1.0 + lax.erf(f * (1.0 / math.sqrt(2.0))))
    f = jnp.dot(f.astype(jnp.bfloat16), w2_ref[...],
                preferred_element_type=jnp.float32) + b2_ref[...]

    out = f + x1                                                     # residual 2
    o_ref[...] = out.reshape(Bb, T, D).astype(o_ref.dtype)


def _pick_block_batch(B, T):
    """Largest divisor of B keeping the block modest, preferring >= 256 rows/step."""
    best = 1
    for bb in range(1, B + 1):
        if B % bb == 0 and bb * T <= 1024:
            best = bb
            if bb * T >= 256:
                break
    return best


def _const_index_map(shape):
    zeros = tuple(0 for _ in shape)
    return lambda b, _z=zeros: _z


def _build_transformer_call(B, T, D, F, Bb, n_heads, out_dtype,
                            vmem_limit_bytes, single_buffer_weights):
    def wspec(shape):
        # Grid-invariant operand: single-buffer it when supported.
        if single_buffer_weights:
            return pl.BlockSpec(shape, _const_index_map(shape),
                                pipeline_mode=pl.Buffered(1))
        return pl.BlockSpec(shape, _const_index_map(shape))

    in_specs = [
        pl.BlockSpec((Bb, T, D), lambda b: (b, 0, 0)),   # x
        wspec((1, D)), wspec((1, D)),                    # ln1 gamma, beta
        wspec((D, 3 * D)), wspec((1, 3 * D)),            # fused Wqkv, bqkv
        wspec((D, D)), wspec((1, D)),                    # Wo, bo
        wspec((1, D)), wspec((1, D)),                    # ln2 gamma, beta
        wspec((D, F)), wspec((1, F)),                    # W1, b1
        wspec((F, D)), wspec((1, D)),                    # W2, b2
    ]
    out_spec = pl.BlockSpec((Bb, T, D), lambda b: (b, 0, 0))

    kernel = functools.partial(transformer_kernel, n_heads=n_heads)
    return pl.pallas_call(
        kernel,
        out_shape=jax.ShapeDtypeStruct((B, T, D), out_dtype),
        grid_spec=pltpu.PrefetchScalarGridSpec(
            num_scalar_prefetch=0,
            grid=(B // Bb,),
            in_specs=in_specs,
            out_specs=out_spec,
        ),
        compiler_params=pltpu.CompilerParams(
            dimension_semantics=("parallel",),
            vmem_limit_bytes=vmem_limit_bytes,
        ),
    )


def transformer_forward(x, params, n_heads):
    B, T, D = x.shape
    F = params["w1"].shape[1]
    Bb = _pick_block_batch(B, T)

    # Fuse Q/K/V weights into one [D, 3D] operand; keep MXU inputs in bf16
    # (f32 accumulation requested at every dot); biases / LN params stay f32.
    wqkv = jnp.concatenate([params["wq"], params["wk"], params["wv"]], axis=1)
    bqkv = jnp.concatenate([params["bq"], params["bk"], params["bv"]], axis=1)
    mxu = jnp.bfloat16
    args = (
        x,
        params["ln1_g"], params["ln1_b"],
        wqkv.astype(mxu), bqkv,
        params["wo"].astype(mxu), params["bo"],
        params["ln2_g"], params["ln2_b"],
        params["w1"].astype(mxu), params["b1"],
        params["w2"].astype(mxu), params["b2"],
    )

    # VMEM budget estimate: weights + pipelined x/out blocks + f32 activation slabs.
    weight_bytes = sum(int(a.size) * a.dtype.itemsize for a in args[1:])
    block_bytes = Bb * T * D * x.dtype.itemsize
    act_bytes = Bb * T * (8 * D + 2 * F) * 4
    est = 2 * weight_bytes + 4 * block_bytes + act_bytes
    vmem_limit = int(min(64 * 2 ** 20, max(16 * 2 ** 20, 2 * est)))

    try:
        fn = _build_transformer_call(B, T, D, F, Bb, n_heads, x.dtype,
                                     vmem_limit, single_buffer_weights=True)
        return fn(*args)
    except Exception:
        # Fallback if pl.Buffered(1) single-buffering is not supported by this jax.
        fn = _build_transformer_call(B, T, D, F, Bb, n_heads, x.dtype,
                                     vmem_limit, single_buffer_weights=False)
        return fn(*args)


def reference_forward(x, params, n_heads):
    # Pure-JAX f32 reference of the same forward pass (for correctness checking).
    B, T, D = x.shape
    Dh = D // n_heads

    def ln(v, g, b, eps=1e-5):
        mu = jnp.mean(v, axis=-1, keepdims=True)
        var = jnp.mean((v - mu) ** 2, axis=-1, keepdims=True)
        return (v - mu) / jnp.sqrt(var + eps) * g + b

    h = ln(x, params["ln1_g"], params["ln1_b"])
    q = h @ params["wq"] + params["bq"]
    k = h @ params["wk"] + params["bk"]
    v = h @ params["wv"] + params["bv"]
    q = q.reshape(B, T, n_heads, Dh).transpose(0, 2, 1, 3)
    k = k.reshape(B, T, n_heads, Dh).transpose(0, 2, 1, 3)
    v = v.reshape(B, T, n_heads, Dh).transpose(0, 2, 1, 3)
    s = (q @ k.transpose(0, 1, 3, 2)) / math.sqrt(Dh)
    mask = jnp.triu(jnp.ones((T, T), dtype=bool), k=1)
    s = jnp.where(mask, -jnp.inf, s)
    p = jax.nn.softmax(s, axis=-1)
    ctx = (p @ v).transpose(0, 2, 1, 3).reshape(B, T, D)
    attn = ctx @ params["wo"] + params["bo"]
    x1 = attn + x
    h2 = ln(x1, params["ln2_g"], params["ln2_b"])
    f = h2 @ params["w1"] + params["b1"]
    f = 0.5 * f * (1.0 + lax.erf(f / math.sqrt(2.0)))
    f = f @ params["w2"] + params["b2"]
    return f + x1


def make_params(key, emb_dim, ff_mult):
    F = emb_dim * ff_mult
    ks = jax.random.split(key, 8)
    scale = 0.05
    p = {
        "ln1_g": jnp.ones((1, emb_dim), jnp.float32),
        "ln1_b": jnp.zeros((1, emb_dim), jnp.float32),
        "ln2_g": jnp.ones((1, emb_dim), jnp.float32),
        "ln2_b": jnp.zeros((1, emb_dim), jnp.float32),
        # weights stored as [in, out] (pre-transposed vs. PyTorch's [out, in])
        "wq": scale * jax.random.normal(ks[0], (emb_dim, emb_dim), jnp.float32),
        "bq": scale * jax.random.normal(ks[1], (1, emb_dim), jnp.float32),
        "wk": scale * jax.random.normal(ks[2], (emb_dim, emb_dim), jnp.float32),
        "bk": scale * jax.random.normal(ks[3], (1, emb_dim), jnp.float32),
        "wv": scale * jax.random.normal(ks[4], (emb_dim, emb_dim), jnp.float32),
        "bv": scale * jax.random.normal(ks[5], (1, emb_dim), jnp.float32),
        "wo": scale * jax.random.normal(ks[6], (emb_dim, emb_dim), jnp.float32),
        "bo": jnp.zeros((1, emb_dim), jnp.float32),
        "w1": scale * jax.random.normal(ks[7], (emb_dim, F), jnp.float32),
        "b1": jnp.zeros((1, F), jnp.float32),
        "w2": scale * jax.random.normal(jax.random.fold_in(key, 99), (F, emb_dim), jnp.float32),
        "b2": jnp.zeros((1, emb_dim), jnp.float32),
    }
    return p


if __name__ == "__main__":
    # Small shapes consistent with the module's forward:
    # context_length=8 (=tokens), emb_dim=32, ff_int_dim_mult=4, n_heads=4, qkv_bias=True
    B, T, D, H, FF_MULT = 2, 8, 32, 4, 4

    key = jax.random.PRNGKey(0)
    kx, kp = jax.random.split(key)
    x = jax.random.normal(kx, (B, T, D), jnp.float32)
    params = make_params(kp, D, FF_MULT)

    out = transformer_forward(x, params, n_heads=H)
    out = jax.block_until_ready(out)

    ref = reference_forward(x, params, n_heads=H)
    assert out.shape == (B, T, D)
    # bf16 MXU inputs (f32 accumulation) -> slightly looser tolerance vs f32 reference.
    assert jnp.allclose(out, ref, atol=2e-2, rtol=2e-2), "mismatch vs. JAX reference"

    print("KERNEL_OK")
</pallas_src>

<mosaic_0001>
module attributes {stable_mosaic.version = 11 : i64} {
  func.func @transformer_kernel(%arg0: i32, %arg1: memref<2x8x32xf32, #tpu.memory_space<vmem>>, %arg2: memref<1x32xf32, #tpu.memory_space<vmem>>, %arg3: memref<1x32xf32, #tpu.memory_space<vmem>>, %arg4: memref<32x96xbf16, #tpu.memory_space<vmem>>, %arg5: memref<1x96xf32, #tpu.memory_space<vmem>>, %arg6: memref<32x32xbf16, #tpu.memory_space<vmem>>, %arg7: memref<1x32xf32, #tpu.memory_space<vmem>>, %arg8: memref<1x32xf32, #tpu.memory_space<vmem>>, %arg9: memref<1x32xf32, #tpu.memory_space<vmem>>, %arg10: memref<32x128xbf16, #tpu.memory_space<vmem>>, %arg11: memref<1x128xf32, #tpu.memory_space<vmem>>, %arg12: memref<128x32xbf16, #tpu.memory_space<vmem>>, %arg13: memref<1x32xf32, #tpu.memory_space<vmem>>, %arg14: memref<2x8x32xf32, #tpu.memory_space<vmem>>) attributes {dimension_semantics = [#tpu.dimension_semantics<parallel>], iteration_bounds = array<i64: 1>, scalar_prefetch = 0 : i64, scratch_operands = 0 : i64, tpu.core_type = #tpu.core_type<tc>, window_params = [{transform_indices = @transform_0, window_bounds = array<i64: 2, 8, 32>}, {pipeline_mode = #tpu.pipeline_mode<synchronous>, transform_indices = @transform_1, window_bounds = array<i64: 1, 32>}, {pipeline_mode = #tpu.pipeline_mode<synchronous>, transform_indices = @transform_2, window_bounds = array<i64: 1, 32>}, {pipeline_mode = #tpu.pipeline_mode<synchronous>, transform_indices = @transform_3, window_bounds = array<i64: 32, 96>}, {pipeline_mode = #tpu.pipeline_mode<synchronous>, transform_indices = @transform_4, window_bounds = array<i64: 1, 96>}, {pipeline_mode = #tpu.pipeline_mode<synchronous>, transform_indices = @transform_5, window_bounds = array<i64: 32, 32>}, {pipeline_mode = #tpu.pipeline_mode<synchronous>, transform_indices = @transform_6, window_bounds = array<i64: 1, 32>}, {pipeline_mode = #tpu.pipeline_mode<synchronous>, transform_indices = @transform_7, window_bounds = array<i64: 1, 32>}, {pipeline_mode = #tpu.pipeline_mode<synchronous>, transform_indices = @transform_8, window_bounds = array<i64: 1, 32>}, {pipeline_mode = #tpu.pipeline_mode<synchronous>, transform_indices = @transform_9, window_bounds = array<i64: 32, 128>}, {pipeline_mode = #tpu.pipeline_mode<synchronous>, transform_indices = @transform_10, window_bounds = array<i64: 1, 128>}, {pipeline_mode = #tpu.pipeline_mode<synchronous>, transform_indices = @transform_11, window_bounds = array<i64: 128, 32>}, {pipeline_mode = #tpu.pipeline_mode<synchronous>, transform_indices = @transform_12, window_bounds = array<i64: 1, 32>}, {transform_indices = @transform_13, window_bounds = array<i64: 2, 8, 32>}]} {
    %c0 = arith.constant 0 : index
    %c0_0 = arith.constant 0 : index
    %c0_1 = arith.constant 0 : index
    %0 = vector.load %arg1[%c0, %c0_0, %c0_1] : memref<2x8x32xf32, #tpu.memory_space<vmem>>, vector<2x8x32xf32>
    %1 = vector.shape_cast %0 : vector<2x8x32xf32> to vector<16x32xf32>
    %c0_2 = arith.constant 0 : index
    %c0_3 = arith.constant 0 : index
    %2 = vector.load %arg2[%c0_2, %c0_3] : memref<1x32xf32, #tpu.memory_space<vmem>>, vector<1x32xf32>
    %c0_4 = arith.constant 0 : index
    %c0_5 = arith.constant 0 : index
    %3 = vector.load %arg3[%c0_4, %c0_5] : memref<1x32xf32, #tpu.memory_space<vmem>>, vector<1x32xf32>
    %cst = arith.constant dense<0.000000e+00> : vector<16xf32>
    %4 = vector.multi_reduction <add>, %1, %cst [1] : vector<16x32xf32> to vector<16xf32>
    %5 = vector.shape_cast %4 : vector<16xf32> to vector<16x1xf32>
    %cst_6 = arith.constant 3.200000e+01 : f32
    %6 = vector.broadcast %cst_6 : f32 to vector<16x1xf32>
    %7 = arith.divf %5, %6 : vector<16x1xf32>
    %8 = vector.broadcast %7 : vector<16x1xf32> to vector<16x32xf32>
    %9 = arith.subf %1, %8 : vector<16x32xf32>
    %10 = arith.mulf %9, %9 : vector<16x32xf32>
    %cst_7 = arith.constant dense<0.000000e+00> : vector<16xf32>
    %11 = vector.multi_reduction <add>, %10, %cst_7 [1] : vector<16x32xf32> to vector<16xf32>
    %12 = vector.shape_cast %11 : vector<16xf32> to vector<16x1xf32>
    %cst_8 = arith.constant 3.200000e+01 : f32
    %13 = vector.broadcast %cst_8 : f32 to vector<16x1xf32>
    %14 = arith.divf %12, %13 : vector<16x1xf32>
    %15 = vector.broadcast %7 : vector<16x1xf32> to vector<16x32xf32>
    %16 = arith.subf %1, %15 : vector<16x32xf32>
    %cst_9 = arith.constant 9.99999974E-6 : f32
    %17 = vector.broadcast %cst_9 : f32 to vector<16x1xf32>
    %18 = arith.addf %14, %17 : vector<16x1xf32>
    %19 = math.rsqrt %18 : vector<16x1xf32>
    %20 = vector.broadcast %19 : vector<16x1xf32> to vector<16x32xf32>
    %21 = arith.mulf %16, %20 : vector<16x32xf32>
    %22 = vector.broadcast %2 : vector<1x32xf32> to vector<16x32xf32>
    %23 = arith.mulf %21, %22 : vector<16x32xf32>
    %24 = vector.broadcast %3 : vector<1x32xf32> to vector<16x32xf32>
    %25 = arith.addf %23, %24 : vector<16x32xf32>
    %26 = arith.truncf %25 : vector<16x32xf32> to vector<16x32xbf16>
    %c0_10 = arith.constant 0 : index
    %c0_11 = arith.constant 0 : index
    %27 = vector.load %arg4[%c0_10, %c0_11] : memref<32x96xbf16, #tpu.memory_space<vmem>>, vector<32x96xbf16>
    %cst_12 = arith.constant dense<0.000000e+00> : vector<16x96xf32>
    %28 = tpu.matmul %26, %27, %cst_12 {dimension_numbers = #tpu.dot_dimension_numbers<[1], [0], [0], [1], [0, 0, 1, 1], [], []>} : vector<16x32xbf16>, vector<32x96xbf16>, vector<16x96xf32> -> vector<16x96xf32>
    %c0_13 = arith.constant 0 : index
    %c0_14 = arith.constant 0 : index
    %29 = vector.load %arg5[%c0_13, %c0_14] : memref<1x96xf32, #tpu.memory_space<vmem>>, vector<1x96xf32>
    %30 = vector.broadcast %29 : vector<1x96xf32> to vector<16x96xf32>
    %31 = arith.addf %28, %30 : vector<16x96xf32>
    %32 = vector.shape_cast %31 : vector<16x96xf32> to vector<2x8x96xf32>
    %33 = vector.extract_strided_slice %32 {offsets = [0, 0, 0], sizes = [2, 8, 32], strides = [1, 1, 1]} : vector<2x8x96xf32> to vector<2x8x32xf32>
    %34 = arith.truncf %33 : vector<2x8x32xf32> to vector<2x8x32xbf16>
    %35 = vector.extract_strided_slice %32 {offsets = [0, 0, 32], sizes = [2, 8, 32], strides = [1, 1, 1]} : vector<2x8x96xf32> to vector<2x8x32xf32>
    %36 = arith.truncf %35 : vector<2x8x32xf32> to vector<2x8x32xbf16>
    %37 = vector.extract_strided_slice %32 {offsets = [0, 0, 64], sizes = [2, 8, 32], strides = [1, 1, 1]} : vector<2x8x96xf32> to vector<2x8x32xf32>
    %38 = arith.truncf %37 : vector<2x8x32xf32> to vector<2x8x32xbf16>
    %39 = tpu.iota {dimensions = array<i32: 1>} : vector<1x8x8xi32>
    %40 = tpu.iota {dimensions = array<i32: 2>} : vector<1x8x8xi32>
    %41 = arith.cmpi sgt, %40, %39 : vector<1x8x8xi32>
    %cst_15 = arith.constant 0xFF800000 : f32
    %cst_16 = arith.constant 0.000000e+00 : f32
    %42 = vector.broadcast %cst_15 : f32 to vector<1x8x8xf32>
    %43 = vector.broadcast %cst_16 : f32 to vector<1x8x8xf32>
    %44 = arith.select %41, %42, %43 : vector<1x8x8xi1>, vector<1x8x8xf32>
    %45 = vector.extract_strided_slice %34 {offsets = [0, 0, 0], sizes = [2, 8, 8], strides = [1, 1, 1]} : vector<2x8x32xbf16> to vector<2x8x8xbf16>
    %46 = vector.extract_strided_slice %36 {offsets = [0, 0, 0], sizes = [2, 8, 8], strides = [1, 1, 1]} : vector<2x8x32xbf16> to vector<2x8x8xbf16>
    "tpu.trace_start"() <{level = 10 : i32, message = "bqd,bkd->bqk"}> : () -> ()
    %cst_17 = arith.constant dense<0.000000e+00> : vector<2x8x8xf32>
    %47 = tpu.matmul %45, %46, %cst_17 {dimension_numbers = #tpu.dot_dimension_numbers<[2], [2], [1], [1], [0, 0, 0, 1, 1, 1], [0], [0]>} : vector<2x8x8xbf16>, vector<2x8x8xbf16>, vector<2x8x8xf32> -> vector<2x8x8xf32>
    "tpu.trace_stop"() : () -> ()
    %cst_18 = arith.constant 0.353553385 : f32
    %48 = vector.broadcast %cst_18 : f32 to vector<2x8x8xf32>
    %49 = arith.mulf %47, %48 : vector<2x8x8xf32>
    %50 = vector.broadcast %44 : vector<1x8x8xf32> to vector<2x8x8xf32>
    %51 = arith.addf %49, %50 : vector<2x8x8xf32>
    %cst_19 = arith.constant dense<0xFF800000> : vector<2x8xf32>
    %52 = vector.multi_reduction <maximumf>, %51, %cst_19 [2] : vector<2x8x8xf32> to vector<2x8xf32>
    %53 = vector.shape_cast %52 : vector<2x8xf32> to vector<2x8x1xf32>
    %54 = vector.broadcast %53 : vector<2x8x1xf32> to vector<2x8x8xf32>
    %55 = arith.subf %51, %54 : vector<2x8x8xf32>
    %56 = math.exp %55 : vector<2x8x8xf32>
    %cst_20 = arith.constant dense<0.000000e+00> : vector<2x8xf32>
    %57 = vector.multi_reduction <add>, %56, %cst_20 [2] : vector<2x8x8xf32> to vector<2x8xf32>
    %58 = vector.shape_cast %57 : vector<2x8xf32> to vector<2x8x1xf32>
    %59 = tpu.reciprocal %58 {approx = true} : vector<2x8x1xf32> -> vector<2x8x1xf32>
    %60 = vector.broadcast %59 : vector<2x8x1xf32> to vector<2x8x8xf32>
    %61 = arith.mulf %56, %60 : vector<2x8x8xf32>
    %62 = arith.truncf %61 : vector<2x8x8xf32> to vector<2x8x8xbf16>
    %63 = vector.extract_strided_slice %38 {offsets = [0, 0, 0], sizes = [2, 8, 8], strides = [1, 1, 1]} : vector<2x8x32xbf16> to vector<2x8x8xbf16>
    "tpu.trace_start"() <{level = 10 : i32, message = "bqk,bkd->bqd"}> : () -> ()
    %cst_21 = arith.constant dense<0.000000e+00> : vector<2x8x8xf32>
    %64 = tpu.matmul %62, %63, %cst_21 {dimension_numbers = #tpu.dot_dimension_numbers<[2], [1], [1], [2], [0, 0, 0, 1, 1, 2], [0], [0]>} : vector<2x8x8xbf16>, vector<2x8x8xbf16>, vector<2x8x8xf32> -> vector<2x8x8xf32>
    "tpu.trace_stop"() : () -> ()
    %65 = vector.extract_strided_slice %34 {offsets = [0, 0, 8], sizes = [2, 8, 8], strides = [1, 1, 1]} : vector<2x8x32xbf16> to vector<2x8x8xbf16>
    %66 = vector.extract_strided_slice %36 {offsets = [0, 0, 8], sizes = [2, 8, 8], strides = [1, 1, 1]} : vector<2x8x32xbf16> to vector<2x8x8xbf16>
    "tpu.trace_start"() <{level = 10 : i32, message = "bqd,bkd->bqk"}> : () -> ()
    %cst_22 = arith.constant dense<0.000000e+00> : vector<2x8x8xf32>
    %67 = tpu.matmul %65, %66, %cst_22 {dimension_numbers = #tpu.dot_dimension_numbers<[2], [2], [1], [1], [0, 0, 0, 1, 1, 1], [0], [0]>} : vector<2x8x8xbf16>, vector<2x8x8xbf16>, vector<2x8x8xf32> -> vector<2x8x8xf32>
    "tpu.trace_stop"() : () -> ()
    %cst_23 = arith.constant 0.353553385 : f32
    %68 = vector.broadcast %cst_23 : f32 to vector<2x8x8xf32>
    %69 = arith.mulf %67, %68 : vector<2x8x8xf32>
    %70 = vector.broadcast %44 : vector<1x8x8xf32> to vector<2x8x8xf32>
    %71 = arith.addf %69, %70 : vector<2x8x8xf32>
    %cst_24 = arith.constant dense<0xFF800000> : vector<2x8xf32>
    %72 = vector.multi_reduction <maximumf>, %71, %cst_24 [2] : vector<2x8x8xf32> to vector<2x8xf32>
    %73 = vector.shape_cast %72 : vector<2x8xf32> to vector<2x8x1xf32>
    %74 = vector.broadcast %73 : vector<2x8x1xf32> to vector<2x8x8xf32>
    %75 = arith.subf %71, %74 : vector<2x8x8xf32>
    %76 = math.exp %75 : vector<2x8x8xf32>
    %cst_25 = arith.constant dense<0.000000e+00> : vector<2x8xf32>
    %77 = vector.multi_reduction <add>, %76, %cst_25 [2] : vector<2x8x8xf32> to vector<2x8xf32>
    %78 = vector.shape_cast %77 : vector<2x8xf32> to vector<2x8x1xf32>
    %79 = tpu.reciprocal %78 {approx = true} : vector<2x8x1xf32> -> vector<2x8x1xf32>
    %80 = vector.broadcast %79 : vector<2x8x1xf32> to vector<2x8x8xf32>
    %81 = arith.mulf %76, %80 : vector<2x8x8xf32>
    %82 = arith.truncf %81 : vector<2x8x8xf32> to vector<2x8x8xbf16>
    %83 = vector.extract_strided_slice %38 {offsets = [0, 0, 8], sizes = [2, 8, 8], strides = [1, 1, 1]} : vector<2x8x32xbf16> to vector<2x8x8xbf16>
    "tpu.trace_start"() <{level = 10 : i32, message = "bqk,bkd->bqd"}> : () -> ()
    %cst_26 = arith.constant dense<0.000000e+00> : vector<2x8x8xf32>
    %84 = tpu.matmul %82, %83, %cst_26 {dimension_numbers = #tpu.dot_dimension_numbers<[2], [1], [1], [2], [0, 0, 0, 1, 1, 2], [0], [0]>} : vector<2x8x8xbf16>, vector<2x8x8xbf16>, vector<2x8x8xf32> -> vector<2x8x8xf32>
    "tpu.trace_stop"() : () -> ()
    %85 = vector.extract_strided_slice %34 {offsets = [0, 0, 16], sizes = [2, 8, 8], strides = [1, 1, 1]} : vector<2x8x32xbf16> to vector<2x8x8xbf16>
    %86 = vector.extract_strided_slice %36 {offsets = [0, 0, 16], sizes = [2, 8, 8], strides = [1, 1, 1]} : vector<2x8x32xbf16> to vector<2x8x8xbf16>
    "tpu.trace_start"() <{level = 10 : i32, message = "bqd,bkd->bqk"}> : () -> ()
    %cst_27 = arith.constant dense<0.000000e+00> : vector<2x8x8xf32>
    %87 = tpu.matmul %85, %86, %cst_27 {dimension_numbers = #tpu.dot_dimension_numbers<[2], [2], [1], [1], [0, 0, 0, 1, 1, 1], [0], [0]>} : vector<2x8x8xbf16>, vector<2x8x8xbf16>, vector<2x8x8xf32> -> vector<2x8x8xf32>
    "tpu.trace_stop"() : () -> ()
    %cst_28 = arith.constant 0.353553385 : f32
    %88 = vector.broadcast %cst_28 : f32 to vector<2x8x8xf32>
    %89 = arith.mulf %87, %88 : vector<2x8x8xf32>
    %90 = vector.broadcast %44 : vector<1x8x8xf32> to vector<2x8x8xf32>
    %91 = arith.addf %89, %90 : vector<2x8x8xf32>
    %cst_29 = arith.constant dense<0xFF800000> : vector<2x8xf32>
    %92 = vector.multi_reduction <maximumf>, %91, %cst_29 [2] : vector<2x8x8xf32> to vector<2x8xf32>
    %93 = vector.shape_cast %92 : vector<2x8xf32> to vector<2x8x1xf32>
    %94 = vector.broadcast %93 : vector<2x8x1xf32> to vector<2x8x8xf32>
    %95 = arith.subf %91, %94 : vector<2x8x8xf32>
    %96 = math.exp %95 : vector<2x8x8xf32>
    %cst_30 = arith.constant dense<0.000000e+00> : vector<2x8xf32>
    %97 = vector.multi_reduction <add>, %96, %cst_30 [2] : vector<2x8x8xf32> to vector<2x8xf32>
    %98 = vector.shape_cast %97 : vector<2x8xf32> to vector<2x8x1xf32>
    %99 = tpu.reciprocal %98 {approx = true} : vector<2x8x1xf32> -> vector<2x8x1xf32>
    %100 = vector.broadcast %99 : vector<2x8x1xf32> to vector<2x8x8xf32>
    %101 = arith.mulf %96, %100 : vector<2x8x8xf32>
    %102 = arith.truncf %101 : vector<2x8x8xf32> to vector<2x8x8xbf16>
    %103 = vector.extract_strided_slice %38 {offsets = [0, 0, 16], sizes = [2, 8, 8], strides = [1, 1, 1]} : vector<2x8x32xbf16> to vector<2x8x8xbf16>
    "tpu.trace_start"() <{level = 10 : i32, message = "bqk,bkd->bqd"}> : () -> ()
    %cst_31 = arith.constant dense<0.000000e+00> : vector<2x8x8xf32>
    %104 = tpu.matmul %102, %103, %cst_31 {dimension_numbers = #tpu.dot_dimension_numbers<[2], [1], [1], [2], [0, 0, 0, 1, 1, 2], [0], [0]>} : vector<2x8x8xbf16>, vector<2x8x8xbf16>, vector<2x8x8xf32> -> vector<2x8x8xf32>
    "tpu.trace_stop"() : () -> ()
    %105 = vector.extract_strided_slice %34 {offsets = [0, 0, 24], sizes = [2, 8, 8], strides = [1, 1, 1]} : vector<2x8x32xbf16> to vector<2x8x8xbf16>
    %106 = vector.extract_strided_slice %36 {offsets = [0, 0, 24], sizes = [2, 8, 8], strides = [1, 1, 1]} : vector<2x8x32xbf16> to vector<2x8x8xbf16>
    "tpu.trace_start"() <{level = 10 : i32, message = "bqd,bkd->bqk"}> : () -> ()
    %cst_32 = arith.constant dense<0.000000e+00> : vector<2x8x8xf32>
    %107 = tpu.matmul %105, %106, %cst_32 {dimension_numbers = #tpu.dot_dimension_numbers<[2], [2], [1], [1], [0, 0, 0, 1, 1, 1], [0], [0]>} : vector<2x8x8xbf16>, vector<2x8x8xbf16>, vector<2x8x8xf32> -> vector<2x8x8xf32>
    "tpu.trace_stop"() : () -> ()
    %cst_33 = arith.constant 0.353553385 : f32
    %108 = vector.broadcast %cst_33 : f32 to vector<2x8x8xf32>
    %109 = arith.mulf %107, %108 : vector<2x8x8xf32>
    %110 = vector.broadcast %44 : vector<1x8x8xf32> to vector<2x8x8xf32>
    %111 = arith.addf %109, %110 : vector<2x8x8xf32>
    %cst_34 = arith.constant dense<0xFF800000> : vector<2x8xf32>
    %112 = vector.multi_reduction <maximumf>, %111, %cst_34 [2] : vector<2x8x8xf32> to vector<2x8xf32>
    %113 = vector.shape_cast %112 : vector<2x8xf32> to vector<2x8x1xf32>
    %114 = vector.broadcast %113 : vector<2x8x1xf32> to vector<2x8x8xf32>
    %115 = arith.subf %111, %114 : vector<2x8x8xf32>
    %116 = math.exp %115 : vector<2x8x8xf32>
    %cst_35 = arith.constant dense<0.000000e+00> : vector<2x8xf32>
    %117 = vector.multi_reduction <add>, %116, %cst_35 [2] : vector<2x8x8xf32> to vector<2x8xf32>
    %118 = vector.shape_cast %117 : vector<2x8xf32> to vector<2x8x1xf32>
    %119 = tpu.reciprocal %118 {approx = true} : vector<2x8x1xf32> -> vector<2x8x1xf32>
    %120 = vector.broadcast %119 : vector<2x8x1xf32> to vector<2x8x8xf32>
    %121 = arith.mulf %116, %120 : vector<2x8x8xf32>
    %122 = arith.truncf %121 : vector<2x8x8xf32> to vector<2x8x8xbf16>
    %123 = vector.extract_strided_slice %38 {offsets = [0, 0, 24], sizes = [2, 8, 8], strides = [1, 1, 1]} : vector<2x8x32xbf16> to vector<2x8x8xbf16>
    "tpu.trace_start"() <{level = 10 : i32, message = "bqk,bkd->bqd"}> : () -> ()
    %cst_36 = arith.constant dense<0.000000e+00> : vector<2x8x8xf32>
    %124 = tpu.matmul %122, %123, %cst_36 {dimension_numbers = #tpu.dot_dimension_numbers<[2], [1], [1], [2], [0, 0, 0, 1, 1, 2], [0], [0]>} : vector<2x8x8xbf16>, vector<2x8x8xbf16>, vector<2x8x8xf32> -> vector<2x8x8xf32>
    "tpu.trace_stop"() : () -> ()
    %125 = tpu.concatenate %64, %84, %104, %124 in 2 : vector<2x8x8xf32>, vector<2x8x8xf32>, vector<2x8x8xf32>, vector<2x8x8xf32> -> vector<2x8x32xf32>
    %126 = vector.shape_cast %125 : vector<2x8x32xf32> to vector<16x32xf32>
    %127 = arith.truncf %126 : vector<16x32xf32> to vector<16x32xbf16>
    %c0_37 = arith.constant 0 : index
    %c0_38 = arith.constant 0 : index
    %128 = vector.load %arg6[%c0_37, %c0_38] : memref<32x32xbf16, #tpu.memory_space<vmem>>, vector<32x32xbf16>
    %cst_39 = arith.constant dense<0.000000e+00> : vector<16x32xf32>
    %129 = tpu.matmul %127, %128, %cst_39 {dimension_numbers = #tpu.dot_dimension_numbers<[1], [0], [0], [1], [0, 0, 1, 1], [], []>} : vector<16x32xbf16>, vector<32x32xbf16>, vector<16x32xf32> -> vector<16x32xf32>
    %c0_40 = arith.constant 0 : index
    %c0_41 = arith.constant 0 : index
    %130 = vector.load %arg7[%c0_40, %c0_41] : memref<1x32xf32, #tpu.memory_space<vmem>>, vector<1x32xf32>
    %131 = vector.broadcast %130 : vector<1x32xf32> to vector<16x32xf32>
    %132 = arith.addf %129, %131 : vector<16x32xf32>
    %133 = arith.addf %132, %1 : vector<16x32xf32>
    %c0_42 = arith.constant 0 : index
    %c0_43 = arith.constant 0 : index
    %134 = vector.load %arg8[%c0_42, %c0_43] : memref<1x32xf32, #tpu.memory_space<vmem>>, vector<1x32xf32>
    %c0_44 = arith.constant 0 : index
    %c0_45 = arith.constant 0 : index
    %135 = vector.load %arg9[%c0_44, %c0_45] : memref<1x32xf32, #tpu.memory_space<vmem>>, vector<1x32xf32>
    %cst_46 = arith.constant dense<0.000000e+00> : vector<16xf32>
    %136 = vector.multi_reduction <add>, %133, %cst_46 [1] : vector<16x32xf32> to vector<16xf32>
    %137 = vector.shape_cast %136 : vector<16xf32> to vector<16x1xf32>
    %cst_47 = arith.constant 3.200000e+01 : f32
    %138 = vector.broadcast %cst_47 : f32 to vector<16x1xf32>
    %139 = arith.divf %137, %138 : vector<16x1xf32>
    %140 = vector.broadcast %139 : vector<16x1xf32> to vector<16x32xf32>
    %141 = arith.subf %133, %140 : vector<16x32xf32>
    %142 = arith.mulf %141, %141 : vector<16x32xf32>
    %cst_48 = arith.constant dense<0.000000e+00> : vector<16xf32>
    %143 = vector.multi_reduction <add>, %142, %cst_48 [1] : vector<16x32xf32> to vector<16xf32>
    %144 = vector.shape_cast %143 : vector<16xf32> to vector<16x1xf32>
    %cst_49 = arith.constant 3.200000e+01 : f32
    %145 = vector.broadcast %cst_49 : f32 to vector<16x1xf32>
    %146 = arith.divf %144, %145 : vector<16x1xf32>
    %147 = vector.broadcast %139 : vector<16x1xf32> to vector<16x32xf32>
    %148 = arith.subf %133, %147 : vector<16x32xf32>
    %cst_50 = arith.constant 9.99999974E-6 : f32
    %149 = vector.broadcast %cst_50 : f32 to vector<16x1xf32>
    %150 = arith.addf %146, %149 : vector<16x1xf32>
    %151 = math.rsqrt %150 : vector<16x1xf32>
    %152 = vector.broadcast %151 : vector<16x1xf32> to vector<16x32xf32>
    %153 = arith.mulf %148, %152 : vector<16x32xf32>
    %154 = vector.broadcast %134 : vector<1x32xf32> to vector<16x32xf32>
    %155 = arith.mulf %153, %154 : vector<16x32xf32>
    %156 = vector.broadcast %135 : vector<1x32xf32> to vector<16x32xf32>
    %157 = arith.addf %155, %156 : vector<16x32xf32>
    %158 = arith.truncf %157 : vector<16x32xf32> to vector<16x32xbf16>
    %c0_51 = arith.constant 0 : index
    %c0_52 = arith.constant 0 : index
    %159 = vector.load %arg10[%c0_51, %c0_52] : memref<32x128xbf16, #tpu.memory_space<vmem>>, vector<32x128xbf16>
    %cst_53 = arith.constant dense<0.000000e+00> : vector<16x128xf32>
    %160 = tpu.matmul %158, %159, %cst_53 {dimension_numbers = #tpu.dot_dimension_numbers<[1], [0], [0], [1], [0, 0, 1, 1], [], []>} : vector<16x32xbf16>, vector<32x128xbf16>, vector<16x128xf32> -> vector<16x128xf32>
    %c0_54 = arith.constant 0 : index
    %c0_55 = arith.constant 0 : index
    %161 = vector.load %arg11[%c0_54, %c0_55] : memref<1x128xf32, #tpu.memory_space<vmem>>, vector<1x128xf32>
    %162 = vector.broadcast %161 : vector<1x128xf32> to vector<16x128xf32>
    %163 = arith.addf %160, %162 : vector<16x128xf32>
    %cst_56 = arith.constant 5.000000e-01 : f32
    %164 = vector.broadcast %cst_56 : f32 to vector<16x128xf32>
    %165 = arith.mulf %164, %163 : vector<16x128xf32>
    %cst_57 = arith.constant 0.707106769 : f32
    %166 = vector.broadcast %cst_57 : f32 to vector<16x128xf32>
    %167 = arith.mulf %163, %166 : vector<16x128xf32>
    %168 = math.erf %167 : vector<16x128xf32>
    %cst_58 = arith.constant 1.000000e+00 : f32
    %169 = vector.broadcast %cst_58 : f32 to vector<16x128xf32>
    %170 = arith.addf %169, %168 : vector<16x128xf32>
    %171 = arith.mulf %165, %170 : vector<16x128xf32>
    %172 = arith.truncf %171 : vector<16x128xf32> to vector<16x128xbf16>
    %c0_59 = arith.constant 0 : index
    %c0_60 = arith.constant 0 : index
    %173 = vector.load %arg12[%c0_59, %c0_60] : memref<128x32xbf16, #tpu.memory_space<vmem>>, vector<128x32xbf16>
    %cst_61 = arith.constant dense<0.000000e+00> : vector<16x32xf32>
    %174 = tpu.matmul %172, %173, %cst_61 {dimension_numbers = #tpu.dot_dimension_numbers<[1], [0], [0], [1], [0, 0, 1, 1], [], []>} : vector<16x128xbf16>, vector<128x32xbf16>, vector<16x32xf32> -> vector<16x32xf32>
    %c0_62 = arith.constant 0 : index
    %c0_63 = arith.constant 0 : index
    %175 = vector.load %arg13[%c0_62, %c0_63] : memref<1x32xf32, #tpu.memory_space<vmem>>, vector<1x32xf32>
    %176 = vector.broadcast %175 : vector<1x32xf32> to vector<16x32xf32>
    %177 = arith.addf %174, %176 : vector<16x32xf32>
    %178 = arith.addf %177, %133 : vector<16x32xf32>
    %179 = vector.shape_cast %178 : vector<16x32xf32> to vector<2x8x32xf32>
    %c0_64 = arith.constant 0 : index
    %c0_65 = arith.constant 0 : index
    %c0_66 = arith.constant 0 : index
    %180 = vector.load %arg14[%c0_64, %c0_65, %c0_66] : memref<2x8x32xf32, #tpu.memory_space<vmem>>, vector<2x8x32xf32>
    tpu.vector_store %arg14[%c0_64, %c0_65, %c0_66], %179 {strides = array<i32>} : memref<2x8x32xf32, #tpu.memory_space<vmem>>, vector<2x8x32xf32>,
    return
  }
  func.func @transform_0(%arg0: i32) -> (i32, i32, i32) {
    %c0_i32 = arith.constant 0 : i32
    %c0_i32_0 = arith.constant 0 : i32
    %c0_i32_1 = arith.constant 0 : i32
    return %arg0, %c0_i32, %c0_i32_0 : i32, i32, i32
  }
  func.func @transform_1(%arg0: i32) -> (i32, i32) {
    %c0_i32 = arith.constant 0 : i32
    %c0_i32_0 = arith.constant 0 : i32
    %c0_i32_1 = arith.constant 0 : i32
    return %c0_i32, %c0_i32_0 : i32, i32
  }
  func.func @transform_2(%arg0: i32) -> (i32, i32) {
    %c0_i32 = arith.constant 0 : i32
    %c0_i32_0 = arith.constant 0 : i32
    %c0_i32_1 = arith.constant 0 : i32
    return %c0_i32, %c0_i32_0 : i32, i32
  }
  func.func @transform_3(%arg0: i32) -> (i32, i32) {
    %c0_i32 = arith.constant 0 : i32
    %c0_i32_0 = arith.constant 0 : i32
    %c0_i32_1 = arith.constant 0 : i32
    return %c0_i32, %c0_i32_0 : i32, i32
  }
  func.func @transform_4(%arg0: i32) -> (i32, i32) {
    %c0_i32 = arith.constant 0 : i32
    %c0_i32_0 = arith.constant 0 : i32
    %c0_i32_1 = arith.constant 0 : i32
    return %c0_i32, %c0_i32_0 : i32, i32
  }
  func.func @transform_5(%arg0: i32) -> (i32, i32) {
    %c0_i32 = arith.constant 0 : i32
    %c0_i32_0 = arith.constant 0 : i32
    %c0_i32_1 = arith.constant 0 : i32
    return %c0_i32, %c0_i32_0 : i32, i32
  }
  func.func @transform_6(%arg0: i32) -> (i32, i32) {
    %c0_i32 = arith.constant 0 : i32
    %c0_i32_0 = arith.constant 0 : i32
    %c0_i32_1 = arith.constant 0 : i32
    return %c0_i32, %c0_i32_0 : i32, i32
  }
  func.func @transform_7(%arg0: i32) -> (i32, i32) {
    %c0_i32 = arith.constant 0 : i32
    %c0_i32_0 = arith.constant 0 : i32
    %c0_i32_1 = arith.constant 0 : i32
    return %c0_i32, %c0_i32_0 : i32, i32
  }
  func.func @transform_8(%arg0: i32) -> (i32, i32) {
    %c0_i32 = arith.constant 0 : i32
    %c0_i32_0 = arith.constant 0 : i32
    %c0_i32_1 = arith.constant 0 : i32
    return %c0_i32, %c0_i32_0 : i32, i32
  }
  func.func @transform_9(%arg0: i32) -> (i32, i32) {
    %c0_i32 = arith.constant 0 : i32
    %c0_i32_0 = arith.constant 0 : i32
    %c0_i32_1 = arith.constant 0 : i32
    return %c0_i32, %c0_i32_0 : i32, i32
  }
  func.func @transform_10(%arg0: i32) -> (i32, i32) {
    %c0_i32 = arith.constant 0 : i32
    %c0_i32_0 = arith.constant 0 : i32
    %c0_i32_1 = arith.constant 0 : i32
    return %c0_i32, %c0_i32_0 : i32, i32
  }
  func.func @transform_11(%arg0: i32) -> (i32, i32) {
    %c0_i32 = arith.constant 0 : i32
    %c0_i32_0 = arith.constant 0 : i32
    %c0_i32_1 = arith.constant 0 : i32
    return %c0_i32, %c0_i32_0 : i32, i32
  }
  func.func @transform_12(%arg0: i32) -> (i32, i32) {
    %c0_i32 = arith.constant 0 : i32
    %c0_i32_0 = arith.constant 0 : i32
    %c0_i32_1 = arith.constant 0 : i32
    return %c0_i32, %c0_i32_0 : i32, i32
  }
  func.func @transform_13(%arg0: i32) -> (i32, i32, i32) {
    %c0_i32 = arith.constant 0 : i32
    %c0_i32_0 = arith.constant 0 : i32
    %c0_i32_1 = arith.constant 0 : i32
    return %arg0, %c0_i32, %c0_i32_0 : i32, i32, i32
  }
}

module attributes {stable_mosaic.version = 11 : i64} {
  func.func @transformer_kernel(%arg0: i32, %arg1: memref<2x8x32xf32, #tpu.memory_space<vmem>>, %arg2: memref<1x32xf32, #tpu.memory_space<vmem>>, %arg3: memref<1x32xf32, #tpu.memory_space<vmem>>, %arg4: memref<32x96xbf16, #tpu.memory_space<vmem>>, %arg5: memref<1x96xf32, #tpu.memory_space<vmem>>, %arg6: memref<32x32xbf16, #tpu.memory_space<vmem>>, %arg7: memref<1x32xf32, #tpu.memory_space<vmem>>, %arg8: memref<1x32xf32, #tpu.memory_space<vmem>>, %arg9: memref<1x32xf32, #tpu.memory_space<vmem>>, %arg10: memref<32x128xbf16, #tpu.memory_space<vmem>>, %arg11: memref<1x128xf32, #tpu.memory_space<vmem>>, %arg12: memref<128x32xbf16, #tpu.memory_space<vmem>>, %arg13: memref<1x32xf32, #tpu.memory_space<vmem>>, %arg14: memref<2x8x32xf32, #tpu.memory_space<vmem>>) attributes {dimension_semantics = [#tpu.dimension_semantics<parallel>], iteration_bounds = array<i64: 1>, scalar_prefetch = 0 : i64, scratch_operands = 0 : i64, tpu.core_type = #tpu.core_type<tc>, window_params = [{transform_indices = @transform_0, window_bounds = array<i64: 2, 8, 32>}, {pipeline_mode = #tpu.pipeline_mode<synchronous>, transform_indices = @transform_1, window_bounds = array<i64: 1, 32>}, {pipeline_mode = #tpu.pipeline_mode<synchronous>, transform_indices = @transform_2, window_bounds = array<i64: 1, 32>}, {pipeline_mode = #tpu.pipeline_mode<synchronous>, transform_indices = @transform_3, window_bounds = array<i64: 32, 96>}, {pipeline_mode = #tpu.pipeline_mode<synchronous>, transform_indices = @transform_4, window_bounds = array<i64: 1, 96>}, {pipeline_mode = #tpu.pipeline_mode<synchronous>, transform_indices = @transform_5, window_bounds = array<i64: 32, 32>}, {pipeline_mode = #tpu.pipeline_mode<synchronous>, transform_indices = @transform_6, window_bounds = array<i64: 1, 32>}, {pipeline_mode = #tpu.pipeline_mode<synchronous>, transform_indices = @transform_7, window_bounds = array<i64: 1, 32>}, {pipeline_mode = #tpu.pipeline_mode<synchronous>, transform_indices = @transform_8, window_bounds = array<i64: 1, 32>}, {pipeline_mode = #tpu.pipeline_mode<synchronous>, transform_indices = @transform_9, window_bounds = array<i64: 32, 128>}, {pipeline_mode = #tpu.pipeline_mode<synchronous>, transform_indices = @transform_10, window_bounds = array<i64: 1, 128>}, {pipeline_mode = #tpu.pipeline_mode<synchronous>, transform_indices = @transform_11, window_bounds = array<i64: 128, 32>}, {pipeline_mode = #tpu.pipeline_mode<synchronous>, transform_indices = @transform_12, window_bounds = array<i64: 1, 32>}, {transform_indices = @transform_13, window_bounds = array<i64: 2, 8, 32>}]} {
    %c0 = arith.constant 0 : index
    %c0_0 = arith.constant 0 : index
    %c0_1 = arith.constant 0 : index
    %0 = vector.load %arg1[%c0, %c0_0, %c0_1] : memref<2x8x32xf32, #tpu.memory_space<vmem>>, vector<2x8x32xf32>
    %1 = vector.shape_cast %0 : vector<2x8x32xf32> to vector<16x32xf32>
    %c0_2 = arith.constant 0 : index
    %c0_3 = arith.constant 0 : index
    %2 = vector.load %arg2[%c0_2, %c0_3] : memref<1x32xf32, #tpu.memory_space<vmem>>, vector<1x32xf32>
    %c0_4 = arith.constant 0 : index
    %c0_5 = arith.constant 0 : index
    %3 = vector.load %arg3[%c0_4, %c0_5] : memref<1x32xf32, #tpu.memory_space<vmem>>, vector<1x32xf32>
    %cst = arith.constant dense<0.000000e+00> : vector<16xf32>
    %4 = vector.multi_reduction <add>, %1, %cst [1] : vector<16x32xf32> to vector<16xf32>
    %5 = vector.shape_cast %4 : vector<16xf32> to vector<16x1xf32>
    %cst_6 = arith.constant 3.200000e+01 : f32
    %6 = vector.broadcast %cst_6 : f32 to vector<16x1xf32>
    %7 = arith.divf %5, %6 : vector<16x1xf32>
    %8 = vector.broadcast %7 : vector<16x1xf32> to vector<16x32xf32>
    %9 = arith.subf %1, %8 : vector<16x32xf32>
    %10 = arith.mulf %9, %9 : vector<16x32xf32>
    %cst_7 = arith.constant dense<0.000000e+00> : vector<16xf32>
    %11 = vector.multi_reduction <add>, %10, %cst_7 [1] : vector<16x32xf32> to vector<16xf32>
    %12 = vector.shape_cast %11 : vector<16xf32> to vector<16x1xf32>
    %cst_8 = arith.constant 3.200000e+01 : f32
    %13 = vector.broadcast %cst_8 : f32 to vector<16x1xf32>
    %14 = arith.divf %12, %13 : vector<16x1xf32>
    %15 = vector.broadcast %7 : vector<16x1xf32> to vector<16x32xf32>
    %16 = arith.subf %1, %15 : vector<16x32xf32>
    %cst_9 = arith.constant 9.99999974E-6 : f32
    %17 = vector.broadcast %cst_9 : f32 to vector<16x1xf32>
    %18 = arith.addf %14, %17 : vector<16x1xf32>
    %19 = math.rsqrt %18 : vector<16x1xf32>
    %20 = vector.broadcast %19 : vector<16x1xf32> to vector<16x32xf32>
    %21 = arith.mulf %16, %20 : vector<16x32xf32>
    %22 = vector.broadcast %2 : vector<1x32xf32> to vector<16x32xf32>
    %23 = arith.mulf %21, %22 : vector<16x32xf32>
    %24 = vector.broadcast %3 : vector<1x32xf32> to vector<16x32xf32>
    %25 = arith.addf %23, %24 : vector<16x32xf32>
    %26 = arith.truncf %25 : vector<16x32xf32> to vector<16x32xbf16>
    %c0_10 = arith.constant 0 : index
    %c0_11 = arith.constant 0 : index
    %27 = vector.load %arg4[%c0_10, %c0_11] : memref<32x96xbf16, #tpu.memory_space<vmem>>, vector<32x96xbf16>
    %cst_12 = arith.constant dense<0.000000e+00> : vector<16x96xf32>
    %28 = tpu.matmul %26, %27, %cst_12 {dimension_numbers = #tpu.dot_dimension_numbers<[1], [0], [0], [1], [0, 0, 1, 1], [], []>} : vector<16x32xbf16>, vector<32x96xbf16>, vector<16x96xf32> -> vector<16x96xf32>
    %c0_13 = arith.constant 0 : index
    %c0_14 = arith.constant 0 : index
    %29 = vector.load %arg5[%c0_13, %c0_14] : memref<1x96xf32, #tpu.memory_space<vmem>>, vector<1x96xf32>
    %30 = vector.broadcast %29 : vector<1x96xf32> to vector<16x96xf32>
    %31 = arith.addf %28, %30 : vector<16x96xf32>
    %32 = vector.shape_cast %31 : vector<16x96xf32> to vector<2x8x96xf32>
    %33 = vector.extract_strided_slice %32 {offsets = [0, 0, 0], sizes = [2, 8, 32], strides = [1, 1, 1]} : vector<2x8x96xf32> to vector<2x8x32xf32>
    %34 = arith.truncf %33 : vector<2x8x32xf32> to vector<2x8x32xbf16>
    %35 = vector.extract_strided_slice %32 {offsets = [0, 0, 32], sizes = [2, 8, 32], strides = [1, 1, 1]} : vector<2x8x96xf32> to vector<2x8x32xf32>
    %36 = arith.truncf %35 : vector<2x8x32xf32> to vector<2x8x32xbf16>
    %37 = vector.extract_strided_slice %32 {offsets = [0, 0, 64], sizes = [2, 8, 32], strides = [1, 1, 1]} : vector<2x8x96xf32> to vector<2x8x32xf32>
    %38 = arith.truncf %37 : vector<2x8x32xf32> to vector<2x8x32xbf16>
    %39 = tpu.iota {dimensions = array<i32: 1>} : vector<1x8x8xi32>
    %40 = tpu.iota {dimensions = array<i32: 2>} : vector<1x8x8xi32>
    %41 = arith.cmpi sgt, %40, %39 : vector<1x8x8xi32>
    %cst_15 = arith.constant 0xFF800000 : f32
    %cst_16 = arith.constant 0.000000e+00 : f32
    %42 = vector.broadcast %cst_15 : f32 to vector<1x8x8xf32>
    %43 = vector.broadcast %cst_16 : f32 to vector<1x8x8xf32>
    %44 = arith.select %41, %42, %43 : vector<1x8x8xi1>, vector<1x8x8xf32>
    %45 = vector.extract_strided_slice %34 {offsets = [0, 0, 0], sizes = [2, 8, 8], strides = [1, 1, 1]} : vector<2x8x32xbf16> to vector<2x8x8xbf16>
    %46 = vector.extract_strided_slice %36 {offsets = [0, 0, 0], sizes = [2, 8, 8], strides = [1, 1, 1]} : vector<2x8x32xbf16> to vector<2x8x8xbf16>
    "tpu.trace_start"() <{level = 10 : i32, message = "bqd,bkd->bqk"}> : () -> ()
    %cst_17 = arith.constant dense<0.000000e+00> : vector<2x8x8xf32>
    %47 = tpu.matmul %45, %46, %cst_17 {dimension_numbers = #tpu.dot_dimension_numbers<[2], [2], [1], [1], [0, 0, 0, 1, 1, 1], [0], [0]>} : vector<2x8x8xbf16>, vector<2x8x8xbf16>, vector<2x8x8xf32> -> vector<2x8x8xf32>
    "tpu.trace_stop"() : () -> ()
    %cst_18 = arith.constant 0.353553385 : f32
    %48 = vector.broadcast %cst_18 : f32 to vector<2x8x8xf32>
    %49 = arith.mulf %47, %48 : vector<2x8x8xf32>
    %50 = vector.broadcast %44 : vector<1x8x8xf32> to vector<2x8x8xf32>
    %51 = arith.addf %49, %50 : vector<2x8x8xf32>
    %cst_19 = arith.constant dense<0xFF800000> : vector<2x8xf32>
    %52 = vector.multi_reduction <maximumf>, %51, %cst_19 [2] : vector<2x8x8xf32> to vector<2x8xf32>
    %53 = vector.shape_cast %52 : vector<2x8xf32> to vector<2x8x1xf32>
    %54 = vector.broadcast %53 : vector<2x8x1xf32> to vector<2x8x8xf32>
    %55 = arith.subf %51, %54 : vector<2x8x8xf32>
    %56 = math.exp %55 : vector<2x8x8xf32>
    %cst_20 = arith.constant dense<0.000000e+00> : vector<2x8xf32>
    %57 = vector.multi_reduction <add>, %56, %cst_20 [2] : vector<2x8x8xf32> to vector<2x8xf32>
    %58 = vector.shape_cast %57 : vector<2x8xf32> to vector<2x8x1xf32>
    %59 = tpu.reciprocal %58 {approx = true} : vector<2x8x1xf32> -> vector<2x8x1xf32>
    %60 = vector.broadcast %59 : vector<2x8x1xf32> to vector<2x8x8xf32>
    %61 = arith.mulf %56, %60 : vector<2x8x8xf32>
    %62 = arith.truncf %61 : vector<2x8x8xf32> to vector<2x8x8xbf16>
    %63 = vector.extract_strided_slice %38 {offsets = [0, 0, 0], sizes = [2, 8, 8], strides = [1, 1, 1]} : vector<2x8x32xbf16> to vector<2x8x8xbf16>
    "tpu.trace_start"() <{level = 10 : i32, message = "bqk,bkd->bqd"}> : () -> ()
    %cst_21 = arith.constant dense<0.000000e+00> : vector<2x8x8xf32>
    %64 = tpu.matmul %62, %63, %cst_21 {dimension_numbers = #tpu.dot_dimension_numbers<[2], [1], [1], [2], [0, 0, 0, 1, 1, 2], [0], [0]>} : vector<2x8x8xbf16>, vector<2x8x8xbf16>, vector<2x8x8xf32> -> vector<2x8x8xf32>
    "tpu.trace_stop"() : () -> ()
    %65 = vector.extract_strided_slice %34 {offsets = [0, 0, 8], sizes = [2, 8, 8], strides = [1, 1, 1]} : vector<2x8x32xbf16> to vector<2x8x8xbf16>
    %66 = vector.extract_strided_slice %36 {offsets = [0, 0, 8], sizes = [2, 8, 8], strides = [1, 1, 1]} : vector<2x8x32xbf16> to vector<2x8x8xbf16>
    "tpu.trace_start"() <{level = 10 : i32, message = "bqd,bkd->bqk"}> : () -> ()
    %cst_22 = arith.constant dense<0.000000e+00> : vector<2x8x8xf32>
    %67 = tpu.matmul %65, %66, %cst_22 {dimension_numbers = #tpu.dot_dimension_numbers<[2], [2], [1], [1], [0, 0, 0, 1, 1, 1], [0], [0]>} : vector<2x8x8xbf16>, vector<2x8x8xbf16>, vector<2x8x8xf32> -> vector<2x8x8xf32>
    "tpu.trace_stop"() : () -> ()
    %cst_23 = arith.constant 0.353553385 : f32
    %68 = vector.broadcast %cst_23 : f32 to vector<2x8x8xf32>
    %69 = arith.mulf %67, %68 : vector<2x8x8xf32>
    %70 = vector.broadcast %44 : vector<1x8x8xf32> to vector<2x8x8xf32>
    %71 = arith.addf %69, %70 : vector<2x8x8xf32>
    %cst_24 = arith.constant dense<0xFF800000> : vector<2x8xf32>
    %72 = vector.multi_reduction <maximumf>, %71, %cst_24 [2] : vector<2x8x8xf32> to vector<2x8xf32>
    %73 = vector.shape_cast %72 : vector<2x8xf32> to vector<2x8x1xf32>
    %74 = vector.broadcast %73 : vector<2x8x1xf32> to vector<2x8x8xf32>
    %75 = arith.subf %71, %74 : vector<2x8x8xf32>
    %76 = math.exp %75 : vector<2x8x8xf32>
    %cst_25 = arith.constant dense<0.000000e+00> : vector<2x8xf32>
    %77 = vector.multi_reduction <add>, %76, %cst_25 [2] : vector<2x8x8xf32> to vector<2x8xf32>
    %78 = vector.shape_cast %77 : vector<2x8xf32> to vector<2x8x1xf32>
    %79 = tpu.reciprocal %78 {approx = true} : vector<2x8x1xf32> -> vector<2x8x1xf32>
    %80 = vector.broadcast %79 : vector<2x8x1xf32> to vector<2x8x8xf32>
    %81 = arith.mulf %76, %80 : vector<2x8x8xf32>
    %82 = arith.truncf %81 : vector<2x8x8xf32> to vector<2x8x8xbf16>
    %83 = vector.extract_strided_slice %38 {offsets = [0, 0, 8], sizes = [2, 8, 8], strides = [1, 1, 1]} : vector<2x8x32xbf16> to vector<2x8x8xbf16>
    "tpu.trace_start"() <{level = 10 : i32, message = "bqk,bkd->bqd"}> : () -> ()
    %cst_26 = arith.constant dense<0.000000e+00> : vector<2x8x8xf32>
    %84 = tpu.matmul %82, %83, %cst_26 {dimension_numbers = #tpu.dot_dimension_numbers<[2], [1], [1], [2], [0, 0, 0, 1, 1, 2], [0], [0]>} : vector<2x8x8xbf16>, vector<2x8x8xbf16>, vector<2x8x8xf32> -> vector<2x8x8xf32>
    "tpu.trace_stop"() : () -> ()
    %85 = vector.extract_strided_slice %34 {offsets = [0, 0, 16], sizes = [2, 8, 8], strides = [1, 1, 1]} : vector<2x8x32xbf16> to vector<2x8x8xbf16>
    %86 = vector.extract_strided_slice %36 {offsets = [0, 0, 16], sizes = [2, 8, 8], strides = [1, 1, 1]} : vector<2x8x32xbf16> to vector<2x8x8xbf16>
    "tpu.trace_start"() <{level = 10 : i32, message = "bqd,bkd->bqk"}> : () -> ()
    %cst_27 = arith.constant dense<0.000000e+00> : vector<2x8x8xf32>
    %87 = tpu.matmul %85, %86, %cst_27 {dimension_numbers = #tpu.dot_dimension_numbers<[2], [2], [1], [1], [0, 0, 0, 1, 1, 1], [0], [0]>} : vector<2x8x8xbf16>, vector<2x8x8xbf16>, vector<2x8x8xf32> -> vector<2x8x8xf32>
    "tpu.trace_stop"() : () -> ()
    %cst_28 = arith.constant 0.353553385 : f32
    %88 = vector.broadcast %cst_28 : f32 to vector<2x8x8xf32>
    %89 = arith.mulf %87, %88 : vector<2x8x8xf32>
    %90 = vector.broadcast %44 : vector<1x8x8xf32> to vector<2x8x8xf32>
    %91 = arith.addf %89, %90 : vector<2x8x8xf32>
    %cst_29 = arith.constant dense<0xFF800000> : vector<2x8xf32>
    %92 = vector.multi_reduction <maximumf>, %91, %cst_29 [2] : vector<2x8x8xf32> to vector<2x8xf32>
    %93 = vector.shape_cast %92 : vector<2x8xf32> to vector<2x8x1xf32>
    %94 = vector.broadcast %93 : vector<2x8x1xf32> to vector<2x8x8xf32>
    %95 = arith.subf %91, %94 : vector<2x8x8xf32>
    %96 = math.exp %95 : vector<2x8x8xf32>
    %cst_30 = arith.constant dense<0.000000e+00> : vector<2x8xf32>
    %97 = vector.multi_reduction <add>, %96, %cst_30 [2] : vector<2x8x8xf32> to vector<2x8xf32>
    %98 = vector.shape_cast %97 : vector<2x8xf32> to vector<2x8x1xf32>
    %99 = tpu.reciprocal %98 {approx = true} : vector<2x8x1xf32> -> vector<2x8x1xf32>
    %100 = vector.broadcast %99 : vector<2x8x1xf32> to vector<2x8x8xf32>
    %101 = arith.mulf %96, %100 : vector<2x8x8xf32>
    %102 = arith.truncf %101 : vector<2x8x8xf32> to vector<2x8x8xbf16>
    %103 = vector.extract_strided_slice %38 {offsets = [0, 0, 16], sizes = [2, 8, 8], strides = [1, 1, 1]} : vector<2x8x32xbf16> to vector<2x8x8xbf16>
    "tpu.trace_start"() <{level = 10 : i32, message = "bqk,bkd->bqd"}> : () -> ()
    %cst_31 = arith.constant dense<0.000000e+00> : vector<2x8x8xf32>
    %104 = tpu.matmul %102, %103, %cst_31 {dimension_numbers = #tpu.dot_dimension_numbers<[2], [1], [1], [2], [0, 0, 0, 1, 1, 2], [0], [0]>} : vector<2x8x8xbf16>, vector<2x8x8xbf16>, vector<2x8x8xf32> -> vector<2x8x8xf32>
    "tpu.trace_stop"() : () -> ()
    %105 = vector.extract_strided_slice %34 {offsets = [0, 0, 24], sizes = [2, 8, 8], strides = [1, 1, 1]} : vector<2x8x32xbf16> to vector<2x8x8xbf16>
    %106 = vector.extract_strided_slice %36 {offsets = [0, 0, 24], sizes = [2, 8, 8], strides = [1, 1, 1]} : vector<2x8x32xbf16> to vector<2x8x8xbf16>
    "tpu.trace_start"() <{level = 10 : i32, message = "bqd,bkd->bqk"}> : () -> ()
    %cst_32 = arith.constant dense<0.000000e+00> : vector<2x8x8xf32>
    %107 = tpu.matmul %105, %106, %cst_32 {dimension_numbers = #tpu.dot_dimension_numbers<[2], [2], [1], [1], [0, 0, 0, 1, 1, 1], [0], [0]>} : vector<2x8x8xbf16>, vector<2x8x8xbf16>, vector<2x8x8xf32> -> vector<2x8x8xf32>
    "tpu.trace_stop"() : () -> ()
    %cst_33 = arith.constant 0.353553385 : f32
    %108 = vector.broadcast %cst_33 : f32 to vector<2x8x8xf32>
    %109 = arith.mulf %107, %108 : vector<2x8x8xf32>
    %110 = vector.broadcast %44 : vector<1x8x8xf32> to vector<2x8x8xf32>
    %111 = arith.addf %109, %110 : vector<2x8x8xf32>
    %cst_34 = arith.constant dense<0xFF800000> : vector<2x8xf32>
    %112 = vector.multi_reduction <maximumf>, %111, %cst_34 [2] : vector<2x8x8xf32> to vector<2x8xf32>
    %113 = vector.shape_cast %112 : vector<2x8xf32> to vector<2x8x1xf32>
    %114 = vector.broadcast %113 : vector<2x8x1xf32> to vector<2x8x8xf32>
    %115 = arith.subf %111, %114 : vector<2x8x8xf32>
    %116 = math.exp %115 : vector<2x8x8xf32>
    %cst_35 = arith.constant dense<0.000000e+00> : vector<2x8xf32>
    %117 = vector.multi_reduction <add>, %116, %cst_35 [2] : vector<2x8x8xf32> to vector<2x8xf32>
    %118 = vector.shape_cast %117 : vector<2x8xf32> to vector<2x8x1xf32>
    %119 = tpu.reciprocal %118 {approx = true} : vector<2x8x1xf32> -> vector<2x8x1xf32>
    %120 = vector.broadcast %119 : vector<2x8x1xf32> to vector<2x8x8xf32>
    %121 = arith.mulf %116, %120 : vector<2x8x8xf32>
    %122 = arith.truncf %121 : vector<2x8x8xf32> to vector<2x8x8xbf16>
    %123 = vector.extract_strided_slice %38 {offsets = [0, 0, 24], sizes = [2, 8, 8], strides = [1, 1, 1]} : vector<2x8x32xbf16> to vector<2x8x8xbf16>
    "tpu.trace_start"() <{level = 10 : i32, message = "bqk,bkd->bqd"}> : () -> ()
    %cst_36 = arith.constant dense<0.000000e+00> : vector<2x8x8xf32>
    %124 = tpu.matmul %122, %123, %cst_36 {dimension_numbers = #tpu.dot_dimension_numbers<[2], [1], [1], [2], [0, 0, 0, 1, 1, 2], [0], [0]>} : vector<2x8x8xbf16>, vector<2x8x8xbf16>, vector<2x8x8xf32> -> vector<2x8x8xf32>
    "tpu.trace_stop"() : () -> ()
    %125 = tpu.concatenate %64, %84, %104, %124 in 2 : vector<2x8x8xf32>, vector<2x8x8xf32>, vector<2x8x8xf32>, vector<2x8x8xf32> -> vector<2x8x32xf32>
    %126 = vector.shape_cast %125 : vector<2x8x32xf32> to vector<16x32xf32>
    %127 = arith.truncf %126 : vector<16x32xf32> to vector<16x32xbf16>
    %c0_37 = arith.constant 0 : index
    %c0_38 = arith.constant 0 : index
    %128 = vector.load %arg6[%c0_37, %c0_38] : memref<32x32xbf16, #tpu.memory_space<vmem>>, vector<32x32xbf16>
    %cst_39 = arith.constant dense<0.000000e+00> : vector<16x32xf32>
    %129 = tpu.matmul %127, %128, %cst_39 {dimension_numbers = #tpu.dot_dimension_numbers<[1], [0], [0], [1], [0, 0, 1, 1], [], []>} : vector<16x32xbf16>, vector<32x32xbf16>, vector<16x32xf32> -> vector<16x32xf32>
    %c0_40 = arith.constant 0 : index
    %c0_41 = arith.constant 0 : index
    %130 = vector.load %arg7[%c0_40, %c0_41] : memref<1x32xf32, #tpu.memory_space<vmem>>, vector<1x32xf32>
    %131 = vector.broadcast %130 : vector<1x32xf32> to vector<16x32xf32>
    %132 = arith.addf %129, %131 : vector<16x32xf32>
    %133 = arith.addf %132, %1 : vector<16x32xf32>
    %c0_42 = arith.constant 0 : index
    %c0_43 = arith.constant 0 : index
    %134 = vector.load %arg8[%c0_42, %c0_43] : memref<1x32xf32, #tpu.memory_space<vmem>>, vector<1x32xf32>
    %c0_44 = arith.constant 0 : index
    %c0_45 = arith.constant 0 : index
    %135 = vector.load %arg9[%c0_44, %c0_45] : memref<1x32xf32, #tpu.memory_space<vmem>>, vector<1x32xf32>
    %cst_46 = arith.constant dense<0.000000e+00> : vector<16xf32>
    %136 = vector.multi_reduction <add>, %133, %cst_46 [1] : vector<16x32xf32> to vector<16xf32>
    %137 = vector.shape_cast %136 : vector<16xf32> to vector<16x1xf32>
    %cst_47 = arith.constant 3.200000e+01 : f32
    %138 = vector.broadcast %cst_47 : f32 to vector<16x1xf32>
    %139 = arith.divf %137, %138 : vector<16x1xf32>
    %140 = vector.broadcast %139 : vector<16x1xf32> to vector<16x32xf32>
    %141 = arith.subf %133, %140 : vector<16x32xf32>
    %142 = arith.mulf %141, %141 : vector<16x32xf32>
    %cst_48 = arith.constant dense<0.000000e+00> : vector<16xf32>
    %143 = vector.multi_reduction <add>, %142, %cst_48 [1] : vector<16x32xf32> to vector<16xf32>
    %144 = vector.shape_cast %143 : vector<16xf32> to vector<16x1xf32>
    %cst_49 = arith.constant 3.200000e+01 : f32
    %145 = vector.broadcast %cst_49 : f32 to vector<16x1xf32>
    %146 = arith.divf %144, %145 : vector<16x1xf32>
    %147 = vector.broadcast %139 : vector<16x1xf32> to vector<16x32xf32>
    %148 = arith.subf %133, %147 : vector<16x32xf32>
    %cst_50 = arith.constant 9.99999974E-6 : f32
    %149 = vector.broadcast %cst_50 : f32 to vector<16x1xf32>
    %150 = arith.addf %146, %149 : vector<16x1xf32>
    %151 = math.rsqrt %150 : vector<16x1xf32>
    %152 = vector.broadcast %151 : vector<16x1xf32> to vector<16x32xf32>
    %153 = arith.mulf %148, %152 : vector<16x32xf32>
    %154 = vector.broadcast %134 : vector<1x32xf32> to vector<16x32xf32>
    %155 = arith.mulf %153, %154 : vector<16x32xf32>
    %156 = vector.broadcast %135 : vector<1x32xf32> to vector<16x32xf32>
    %157 = arith.addf %155, %156 : vector<16x32xf32>
    %158 = arith.truncf %157 : vector<16x32xf32> to vector<16x32xbf16>
    %c0_51 = arith.constant 0 : index
    %c0_52 = arith.constant 0 : index
    %159 = vector.load %arg10[%c0_51, %c0_52] : memref<32x128xbf16, #tpu.memory_space<vmem>>, vector<32x128xbf16>
    %cst_53 = arith.constant dense<0.000000e+00> : vector<16x128xf32>
    %160 = tpu.matmul %158, %159, %cst_53 {dimension_numbers = #tpu.dot_dimension_numbers<[1], [0], [0], [1], [0, 0, 1, 1], [], []>} : vector<16x32xbf16>, vector<32x128xbf16>, vector<16x128xf32> -> vector<16x128xf32>
    %c0_54 = arith.constant 0 : index
    %c0_55 = arith.constant 0 : index
    %161 = vector.load %arg11[%c0_54, %c0_55] : memref<1x128xf32, #tpu.memory_space<vmem>>, vector<1x128xf32>
    %162 = vector.broadcast %161 : vector<1x128xf32> to vector<16x128xf32>
    %163 = arith.addf %160, %162 : vector<16x128xf32>
    %cst_56 = arith.constant 5.000000e-01 : f32
    %164 = vector.broadcast %cst_56 : f32 to vector<16x128xf32>
    %165 = arith.mulf %164, %163 : vector<16x128xf32>
    %cst_57 = arith.constant 0.707106769 : f32
    %166 = vector.broadcast %cst_57 : f32 to vector<16x128xf32>
    %167 = arith.mulf %163, %166 : vector<16x128xf32>
    %168 = math.erf %167 : vector<16x128xf32>
    %cst_58 = arith.constant 1.000000e+00 : f32
    %169 = vector.broadcast %cst_58 : f32 to vector<16x128xf32>
    %170 = arith.addf %169, %168 : vector<16x128xf32>
    %171 = arith.mulf %165, %170 : vector<16x128xf32>
    %172 = arith.truncf %171 : vector<16x128xf32> to vector<16x128xbf16>
    %c0_59 = arith.constant 0 : index
    %c0_60 = arith.constant 0 : index
    %173 = vector.load %arg12[%c0_59, %c0_60] : memref<128x32xbf16, #tpu.memory_space<vmem>>, vector<128x32xbf16>
    %cst_61 = arith.constant dense<0.000000e+00> : vector<16x32xf32>
    %174 = tpu.matmul %172, %173, %cst_61 {dimension_numbers = #tpu.dot_dimension_numbers<[1], [0], [0], [1], [0, 0, 1, 1], [], []>} : vector<16x128xbf16>, vector<128x32xbf16>, vector<16x32xf32> -> vector<16x32xf32>
    %c0_62 = arith.constant 0 : index
    %c0_63 = arith.constant 0 : index
    %175 = vector.load %arg13[%c0_62, %c0_63] : memref<1x32xf32, #tpu.memory_space<vmem>>, vector<1x32xf32>
    %176 = vector.broadcast %175 : vector<1x32xf32> to vector<16x32xf32>
    %177 = arith.addf %174, %176 : vector<16x32xf32>
    %178 = arith.addf %177, %133 : vector<16x32xf32>
    %179 = vector.shape_cast %178 : vector<16x32xf32> to vector<2x8x32xf32>
    %c0_64 = arith.constant 0 : index
    %c0_65 = arith.constant 0 : index
    %c0_66 = arith.constant 0 : index
    %180 = vector.load %arg14[%c0_64, %c0_65, %c0_66] : memref<2x8x32xf32, #tpu.memory_space<vmem>>, vector<2x8x32xf32>
    tpu.vector_store %arg14[%c0_64, %c0_65, %c0_66], %179 {strides = array<i32>} : memref<2x8x32xf32, #tpu.memory_space<vmem>>, vector<2x8x32xf32>,
    return
  }
  func.func @transform_0(%arg0: i32) -> (i32, i32, i32) {
    %c0_i32 = arith.constant 0 : i32
    %c0_i32_0 = arith.constant 0 : i32
    %c0_i32_1 = arith.constant 0 : i32
    return %arg0, %c0_i32, %c0_i32_0 : i32, i32, i32
  }
  func.func @transform_1(%arg0: i32) -> (i32, i32) {
    %c0_i32 = arith.constant 0 : i32
    %c0_i32_0 = arith.constant 0 : i32
    %c0_i32_1 = arith.constant 0 : i32
    return %c0_i32, %c0_i32_0 : i32, i32
  }
  func.func @transform_2(%arg0: i32) -> (i32, i32) {
    %c0_i32 = arith.constant 0 : i32
    %c0_i32_0 = arith.constant 0 : i32
    %c0_i32_1 = arith.constant 0 : i32
    return %c0_i32, %c0_i32_0 : i32, i32
  }
  func.func @transform_3(%arg0: i32) -> (i32, i32) {
    %c0_i32 = arith.constant 0 : i32
    %c0_i32_0 = arith.constant 0 : i32
    %c0_i32_1 = arith.constant 0 : i32
    return %c0_i32, %c0_i32_0 : i32, i32
  }
  func.func @transform_4(%arg0: i32) -> (i32, i32) {
    %c0_i32 = arith.constant 0 : i32
    %c0_i32_0 = arith.constant 0 : i32
    %c0_i32_1 = arith.constant 0 : i32
    return %c0_i32, %c0_i32_0 : i32, i32
  }
  func.func @transform_5(%arg0: i32) -> (i32, i32) {
    %c0_i32 = arith.constant 0 : i32
    %c0_i32_0 = arith.constant 0 : i32
    %c0_i32_1 = arith.constant 0 : i32
    return %c0_i32, %c0_i32_0 : i32, i32
  }
  func.func @transform_6(%arg0: i32) -> (i32, i32) {
    %c0_i32 = arith.constant 0 : i32
    %c0_i32_0 = arith.constant 0 : i32
    %c0_i32_1 = arith.constant 0 : i32
    return %c0_i32, %c0_i32_0 : i32, i32
  }
  func.func @transform_7(%arg0: i32) -> (i32, i32) {
    %c0_i32 = arith.constant 0 : i32
    %c0_i32_0 = arith.constant 0 : i32
    %c0_i32_1 = arith.constant 0 : i32
    return %c0_i32, %c0_i32_0 : i32, i32
  }
  func.func @transform_8(%arg0: i32) -> (i32, i32) {
    %c0_i32 = arith.constant 0 : i32
    %c0_i32_0 = arith.constant 0 : i32
    %c0_i32_1 = arith.constant 0 : i32
    return %c0_i32, %c0_i32_0 : i32, i32
  }
  func.func @transform_9(%arg0: i32) -> (i32, i32) {
    %c0_i32 = arith.constant 0 : i32
    %c0_i32_0 = arith.constant 0 : i32
    %c0_i32_1 = arith.constant 0 : i32
    return %c0_i32, %c0_i32_0 : i32, i32
  }
  func.func @transform_10(%arg0: i32) -> (i32, i32) {
    %c0_i32 = arith.constant 0 : i32
    %c0_i32_0 = arith.constant 0 : i32
    %c0_i32_1 = arith.constant 0 : i32
    return %c0_i32, %c0_i32_0 : i32, i32
  }
  func.func @transform_11(%arg0: i32) -> (i32, i32) {
    %c0_i32 = arith.constant 0 : i32
    %c0_i32_0 = arith.constant 0 : i32
    %c0_i32_1 = arith.constant 0 : i32
    return %c0_i32, %c0_i32_0 : i32, i32
  }
  func.func @transform_12(%arg0: i32) -> (i32, i32) {
    %c0_i32 = arith.constant 0 : i32
    %c0_i32_0 = arith.constant 0 : i32
    %c0_i32_1 = arith.constant 0 : i32
    return %c0_i32, %c0_i32_0 : i32, i32
  }
  func.func @transform_13(%arg0: i32) -> (i32, i32, i32) {
    %c0_i32 = arith.constant 0 : i32
    %c0_i32_0 = arith.constant 0 : i32
    %c0_i32_1 = arith.constant 0 : i32
    return %arg0, %c0_i32, %c0_i32_0 : i32, i32, i32
  }
}

</mosaic_0001>

<bundles_post_ra>
// kernel: tpu_custom_call.1
= control target key start
LH: loop header
LB: loop body
LE: loop exit
PB: predicated region body
PF: predicated region fallthrough
CT: control target
= control target key end

     0   :  { %vm50_vm0 = vcmask 261120   ;;  %s2150_s0 = inlined_call_operand.vmem [shape: f32[2,8,32], index: 0, kind: input, shape index: {}]   ;;  %s2151_s1 = inlined_call_operand.vmem [shape: f32[1,32], index: 1, kind: input, shape index: {}]   ;;  %s2152_s2 = inlined_call_operand.vmem [shape: f32[1,32], index: 2, kind: input, shape index: {}]   ;;  %s2153_s3 = inlined_call_operand.vmem [shape: bf16[32,96], index: 3, kind: input, shape index: {}]   ;;  %s2154_s4 = inlined_call_operand.vmem [shape: f32[1,96], index: 4, kind: input, shape index: {}]   ;;  %s2155_s5 = inlined_call_operand.vmem [shape: bf16[32,32], index: 5, kind: input, shape index: {}]   ;;  %s2156_s6 = inlined_call_operand.vmem [shape: f32[1,32], index: 6, kind: input, shape index: {}]   ;;  %s2157_s7 = inlined_call_operand.vmem [shape: f32[1,32], index: 7, kind: input, shape index: {}]   ;;  %s2158_s8 = inlined_call_operand.vmem [shape: f32[1,32], index: 8, kind: input, shape index: {}]   ;;  %s2159_s9 = inlined_call_operand.vmem [shape: bf16[32,128], index: 9, kind: input, shape index: {}]   ;;  %s2160_s10 = inlined_call_operand.vmem [shape: f32[1,128], index: 10, kind: input, shape index: {}]   ;;  %s2161_s11 = inlined_call_operand.vmem [shape: bf16[128,32], index: 11, kind: input, shape index: {}]   ;;  %s2162_s12 = inlined_call_operand.vmem [shape: f32[1,32], index: 12, kind: input, shape index: {}]   ;;  %s2163_s13 = inlined_call_operand.hbm [shape: f32[2,8,32], index: 13, kind: output, shape index: {}]  }
   0x1   :  { %v1860_v0 = vld [vmem:[%s2150_s0] sm:$0xff]  ;;  %v1865_v1 = vld [vmem:[%s2150_s0 + $0x8] sm:$0xff] }
   0x2   :  { %v51_v2 = vsel %vm50_vm0, %v1860_v0, 0.0  ;;  %v54_v3 = vsel %vm50_vm0, %v1865_v1, 0.0 }
   0x3   :  { %52 = vadd.xlane.f32.xlu0 %v51_v2 }
   0x7   :  { %55 = vadd.xlane.f32.xlu0 %v54_v3 }
   0x8   :  { %18 = vsyncpa [#allocation3], 0  ;;  %v1687_v14 = vld [vmem:[%s2153_s3] sm:$0xff]   ;;  %v1769_v15 = vmov 0.0   ;;  %v1688_v16 = vld [vmem:[%s2153_s3 + $0x8] sm:$0xff]   ;;  %vm1770_vm1 = vmmov 0   ;;  %v164_v47 = vlaneseq }
   0x9   :  { %1514 = vmatprep.subr.bf16.mxu0 %v1769_v15  ;;  %1534 = vmatprep.subr.bf16.mxu1 %v1769_v15  ;;  %v1423_v25 = vld [vmem:[%s2151_s1] ss:$0 sm:$0xff]  ;;  %s1771_s1 = smov 96   ;;  %vm173_vm2 = vcmask 64512   ;;  %vm302_vm4 = vcmask 1043456   ;;  %s1774_s20 = smov 120  }
   0xa   :  { %1515 = vmatpush3.bf16.msra.mxu0 %v1687_v14  ;;  %1518 = vmatprep.mubr.msk.bf16.mxu0 %vm1770_vm1, %v1769_v15  ;;  %v1424_v29 = vld [vmem:[%s2152_s2] ss:$0 sm:$0xff]  ;;  %v165_v48 = vshrl.u32 %v164_v47, 7  ;;  %v167_v49 = vand.u32 127, %v164_v47  ;;  %s1772_s2 = smov 64   ;;  %s1775_s21 = smov 56  }
   0xb   :  { %1516 = vmatprep.subr.bf16.mxu0 %v1769_v15  ;;  %1536 = vmatprep.mubr.msk.bf16.mxu1 %vm1770_vm1, %v1769_v15  ;;  %v1425_v34 = vld [vmem:[%s2154_s4] ss:$0 sm:$0xff]  ;;  %s1773_s4 = smov 88   ;;  %s1776_s22 = smov 80   ;;  %vm1092_vm5 = vcmask 130048   ;;  %vm1095_vm6 = vcmask 195584  }
   0xc   :  { %vm168_vm3 = vcmp.gt.s32.totalorder %v167_v49, %v165_v48  ;;  %s1777_s23 = smov 112   ;;  %s1778_s24 = smov 48  }
   0xd   :  { %v1920_v51 = vsel %vm168_vm3, -inf, %v1769_v15  ;;  %s1779_s25 = smov 72   ;;  %s1780_s26 = smov 104  }
   0xe   :  { %1517 = vmatpush3.bf16.msra.mxu0 %v1688_v16  ;;  %s1781_s27 = smov 40   ;;  %s1782_s28 = smov 8  }
   0xf   :  { %1522 = vmatprep.subr.bf16.mxu0 %v1769_v15  ;;  %s1783_s0 = smov 16   ;;  %s1784_s15 = smov 24  }
  0x90   :  { %v53_v4 = vpop.xlane.xlu0 %52 }
  0x91   :  { %v58_v5 = vmul.f32 0.03125, %v53_v4 }
  0x93   :  { %v60_v6 = vsub.f32 %v1860_v0, %v58_v5 }
  0x94   :  { %v56_v7 = vpop.xlane.xlu0 %55 }
  0x95   :  { %v59_v8 = vmul.f32 0.03125, %v56_v7  ;;  %v62_v9 = vmul.f32 %v60_v6, %v60_v6 }
  0x97   :  { %v61_v10 = vsub.f32 %v1865_v1, %v59_v8  ;;  %v64_v11 = vsel %vm50_vm0, %v62_v9, 0.0 }
  0x98   :  { %65 = vadd.xlane.f32.xlu1 %v64_v11 }
  0x99   :  { %v63_v12 = vmul.f32 %v61_v10, %v61_v10 }
  0x9b   :  { %v67_v13 = vsel %vm50_vm0, %v63_v12, 0.0 }
  0x9c   :  { %68 = vadd.xlane.f32.xlu1 %v67_v13 }
 0x125   :  { %v66_v17 = vpop.xlane.xlu1 %65 }
 0x126   :  { %v70_v18 = vmul.f32 0.03125, %v66_v17 }
 0x128   :  { %v72_v19 = vadd.f32 1e-05, %v70_v18 }
 0x129   :  { %v69_v20 = vpop.xlane.xlu1 %68 }
 0x12a   :  { %1701 = vrsqrt.f32 %v72_v19  ;;  %v71_v21 = vmul.f32 0.03125, %v69_v20 }
 0x12c   :  { %v73_v22 = vadd.f32 1e-05, %v71_v21 }
 0x12e   :  { %1703 = vrsqrt.f32 %v73_v22 }
 0x134   :  { %v1702_v23 = vpop.eup %1701 }
 0x135   :  { %v76_v24 = vmul.f32 %v1702_v23, %v60_v6 }
 0x137   :  { %v84_v28 = vmul.f32 %v1423_v25, %v76_v24 }
 0x138   :  { %v1704_v26 = vpop.eup %1703 }
 0x139   :  { %v77_v27 = vmul.f32 %v1704_v26, %v61_v10  ;;  %v92_v31 = vadd.f32 %v1424_v29, %v84_v28 }
 0x13b   :  { %v85_v30 = vmul.f32 %v1423_v25, %v77_v27 }
 0x13d   :  { %v93_v32 = vadd.f32 %v1424_v29, %v85_v30 }
 0x13f   :  { %v94_v33 = vpack.c.bf16 %v93_v32, %v92_v31 }
 0x141   :  { %1519 = vmatmul.mubr.msk.bf16.vlgmr.msra.gmra.mrb[0].mxu0 %vm50_vm0, %v94_v33 }
 0x142   :  { %1524 = vmatprep.mubr.msk.bf16.mxu0 %vm1770_vm1, %v1769_v15 }
 0x214   :  { %v155_v35 = vpop.f32.mrb[0].mxu0 }
 0x215   :  { %v156_v36 = vadd.f32 %v1425_v34, %v155_v35  ;;  %v1520_v37 = vpop.f32.mrb[1].mxu0 }
 0x216   :  { %v158_v38 = vpop.f32.mrb[2].mxu0 }
 0x217   :  { %v1901_v39 = vpack.c.bf16 %v156_v36, %v156_v36  ;;  %v159_v40 = vadd.f32 %v1425_v34, %v158_v38  ;;  %v1521_v41 = vpop.f32.mrb[3].mxu0 }
 0x219   :  { %v1903_v42 = vpack.c.bf16 %v159_v40, %v159_v40  ;;  %171 = vrot.lane.b32.xlu0 %v1901_v39, %s1771_s1 }
 0x21b   :  { %221 = vrot.lane.b32.xlu1 %v1903_v42, %s1771_s1 }
 0x28b   :  { %v172_v43 = vpop.permute.xlu0 %171 }
 0x28c   :  { %v178_v44 = vsel %vm173_vm2, %v172_v43, 0 }
 0x28d   :  { %1523 = vmatpush3.bf16.xpose.msra.mxu0 %v178_v44  ;;  %v222_v45 = vpop.permute.xlu1 %221 }
 0x28e   :  { %1528 = vmatprep.subr.bf16.mxu0 %v1769_v15  ;;  %v227_v46 = vsel %vm173_vm2, %v222_v45, 0 }
 0x294   :  { %1525 = vmatmul.mubr.msk.bf16.vlgmr.msra.gmra.mrb[4].mxu0 %vm173_vm2, %v1901_v39 }
 0x295   :  { %1529 = vmatpush3.bf16.xpose.msra.mxu0 %v227_v46  ;;  %1530 = vmatprep.mubr.msk.bf16.mxu0 %vm1770_vm1, %v1769_v15 }
 0x296   :  { %1540 = vmatprep.subr.bf16.mxu0 %v1769_v15 }
 0x29c   :  { %1531 = vmatmul.mubr.msk.bf16.vlgmr.msra.gmra.mrb[8].mxu0 %vm173_vm2, %v1903_v42 }
 0x29d   :  { %1542 = vmatprep.mubr.msk.bf16.mxu0 %vm1770_vm1, %v1769_v15 }
 0x367   :  { %v214_v50 = vpop.f32.mrb[4].mxu0 }
 0x368   :  { %v269_v52 = vmul.f32 0.35355338, %v214_v50  ;;  %v1526_v53 = vpop.f32.mrb[5].mxu0 }
 0x369   :  { %v217_v54 = vpop.f32.mrb[6].mxu0 }
 0x36a   :  { %v1527_v55 = vpop.f32.mrb[7].mxu0  ;;  %v271_v56 = vadd.f32 %v269_v52, %v1920_v51 }
 0x36c   :  { %v273_v57 = vsel %vm173_vm2, %v271_v56, -inf }
 0x36d   :  { %274 = vmax.xlane.f32.xlu1 %v273_v57 }
 0x36f   :  { %v263_v58 = vpop.f32.mrb[8].mxu0 }
 0x370   :  { %v270_v59 = vmul.f32 0.35355338, %v263_v58  ;;  %v1532_v60 = vpop.f32.mrb[9].mxu0 }
 0x371   :  { %v266_v61 = vpop.f32.mrb[10].mxu0 }
 0x372   :  { %v1533_v62 = vpop.f32.mrb[11].mxu0  ;;  %v272_v63 = vadd.f32 %v270_v59, %v1920_v51 }
 0x374   :  { %v276_v2 = vsel %vm173_vm2, %v272_v63, -inf }
 0x375   :  { %277 = vmax.xlane.f32.xlu0 %v276_v2 }
 0x37e   :  { %346 = vrot.lane.b32.xlu1 %v1903_v42, %s1772_s2 }
 0x382   :  { %396 = vrot.lane.b32.xlu1 %v1901_v39, %s1773_s4 }
 0x3fa   :  { %v275_v3 = vpop.xlane.xlu1 %274 }
 0x3fb   :  { %v279_v4 = vsub.f32 %v271_v56, %v275_v3 }
 0x3fd   :  { %v281_v5 = vmul.f32 1.442695, %v279_v4 }
 0x3fe   :  { %v347_v6 = vpop.permute.xlu1 %346 }
 0x3ff   :  { %1705 = vpow2.f32 %v281_v5  ;;  %v352_v7 = vsel %vm302_vm4, %v347_v6, 0 }
 0x400   :  { %1541 = vmatpush3.bf16.msra.mxu0 %v352_v7 }
 0x401   :  { %1552 = vmatprep.subr.bf16.mxu0 %v1769_v15 }
 0x402   :  { %v278_v8 = vpop.xlane.xlu0 %277  ;;  %v397_v17 = vpop.permute.xlu1 %396 }
 0x403   :  { %v280_v9 = vsub.f32 %v272_v63, %v278_v8  ;;  %v402_v24 = vsel %vm173_vm2, %v397_v17, 0 }
 0x405   :  { %v283_v10 = vmul.f32 1.442695, %v280_v9 }
 0x407   :  { %1707 = vpow2.f32 %v283_v10 }
 0x409   :  { %v1706_v11 = vpop.eup %1705 }
 0x40a   :  { %v285_v12 = vsel %vm173_vm2, %v1706_v11, 0.0 }
 0x40b   :  { %286 = vadd.xlane.f32.xlu0 %v285_v12 }
 0x411   :  { %v1708_v13 = vpop.eup %1707 }
 0x412   :  { %v288_v14 = vsel %vm173_vm2, %v1708_v13, 0.0 }
 0x413   :  { %289 = vadd.xlane.f32.xlu1 %v288_v14 }
 0x421   :  { %297 = vrot.lane.b32.xlu0 %v1901_v39, %s1772_s2 }
 0x424   :  { %446 = vrot.lane.b32.xlu1 %v1903_v42, %s1773_s4 }
 0x425   :  { %394 = vrot.lane.b32.xlu0 %v1901_v39, %s1774_s20 }
 0x428   :  { %444 = vrot.lane.b32.xlu1 %v1903_v42, %s1774_s20 }
 0x498   :  { %v287_v16 = vpop.xlane.xlu0 %286 }
 0x499   :  { %1709 = vrcp.f32 %v287_v16 }
 0x49c   :  { %v298_v18 = vpop.permute.xlu0 %297 }
 0x49d   :  { %v304_v19 = vsel %vm302_vm4, %v298_v18, 0 }
 0x49e   :  { %1535 = vmatpush3.bf16.msra.mxu1 %v304_v19 }
 0x49f   :  { %1546 = vmatprep.subr.bf16.mxu1 %v1769_v15 }
 0x4a0   :  { %v290_v20 = vpop.xlane.xlu1 %289  ;;  %v395_v29 = vpop.permute.xlu0 %394 }
 0x4a1   :  { %1711 = vrcp.f32 %v290_v20 }
 0x4a3   :  { %v1710_v21 = vpop.eup %1709 }
 0x4a4   :  { %v293_v22 = vmul.f32 %v1710_v21, %v1706_v11  ;;  %v447_v27 = vpop.permute.xlu1 %446 }
 0x4a5   :  { %v452_v30 = vsel %vm173_vm2, %v447_v27, 0 }
 0x4a6   :  { %v295_v23 = vpack.c.bf16 %v293_v22, %v293_v22 }
 0x4a8   :  { %1537 = vmatmul.mubr.msk.bf16.vlgmr.msra.gmra.mrb[0].mxu1 %vm173_vm2, %v295_v23  ;;  %v445_v31 = vpop.permute.xlu1 %444 }
 0x4a9   :  { %1547 = vmatpush3.bf16.xpose.msra.mxu1 %v402_v24  ;;  %1548 = vmatprep.mubr.msk.bf16.mxu1 %vm1770_vm1, %v1769_v15 }
 0x4aa   :  { %1558 = vmatprep.subr.bf16.mxu1 %v1769_v15 }
 0x4ab   :  { %v1712_v25 = vpop.eup %1711 }
 0x4ac   :  { %v294_v26 = vmul.f32 %v1712_v25, %v1708_v13 }
 0x4ae   :  { %v296_v28 = vpack.c.bf16 %v294_v26, %v294_v26 }
 0x4b0   :  { %1543 = vmatmul.mubr.msk.bf16.vlgmr.msra.gmra.mrb[12].mxu0 %vm173_vm2, %v296_v28  ;;  %1549 = vmatmul.mubr.msk.bf16.vlgmr.msra.gmra.mrb[4].mxu1 %vm173_vm2, %v395_v29 }
 0x4b1   :  { %1553 = vmatpush3.bf16.xpose.msra.mxu0 %v452_v30  ;;  %1554 = vmatprep.mubr.msk.bf16.mxu0 %vm1770_vm1, %v1769_v15 }
 0x4b2   :  { %1564 = vmatprep.subr.bf16.mxu0 %v1769_v15  ;;  %1560 = vmatprep.mubr.msk.bf16.mxu1 %vm1770_vm1, %v1769_v15 }
 0x4b8   :  { %1555 = vmatmul.mubr.msk.bf16.vlgmr.msra.gmra.mrb[16].mxu0 %vm173_vm2, %v445_v31 }
 0x4b9   :  { %1566 = vmatprep.mubr.msk.bf16.mxu0 %vm1770_vm1, %v1769_v15 }
 0x57b   :  { %v1954_v32 = vpop.f32.mrb[0].mxu1 }
 0x57c   :  { %v1538_v33 = vpop.f32.mrb[1].mxu1 }
 0x57d   :  { %v343_v34 = vpop.f32.mrb[2].mxu1 }
 0x57e   :  { %v1539_v35 = vpop.f32.mrb[3].mxu1 }
 0x583   :  { %v1956_v36 = vpop.f32.mrb[12].mxu0  ;;  %v438_v37 = vpop.f32.mrb[4].mxu1 }
 0x584   :  { %v494_v38 = vmul.f32 0.35355338, %v438_v37  ;;  %v1544_v40 = vpop.f32.mrb[13].mxu0  ;;  %v1550_v41 = vpop.f32.mrb[5].mxu1 }
 0x585   :  { %v391_v43 = vpop.f32.mrb[14].mxu0  ;;  %v441_v44 = vpop.f32.mrb[6].mxu1 }
 0x586   :  { %v1545_v45 = vpop.f32.mrb[15].mxu0  ;;  %v1551_v46 = vpop.f32.mrb[7].mxu1  ;;  %v496_v47 = vadd.f32 %v494_v38, %v1920_v51 }
 0x588   :  { %v498_v48 = vsel %vm173_vm2, %v496_v47, -inf }
 0x589   :  { %499 = vmax.xlane.f32.xlu0 %v498_v48 }
 0x58b   :  { %v488_v49 = vpop.f32.mrb[16].mxu0 }
 0x58c   :  { %v495_v50 = vmul.f32 0.35355338, %v488_v49  ;;  %v1556_v52 = vpop.f32.mrb[17].mxu0 }
 0x58d   :  { %v491_v53 = vpop.f32.mrb[18].mxu0 }
 0x58e   :  { %v1557_v54 = vpop.f32.mrb[19].mxu0  ;;  %v497_v55 = vadd.f32 %v495_v50, %v1920_v51 }
 0x590   :  { %v501_v56 = vsel %vm173_vm2, %v497_v55, -inf }
 0x591   :  { %502 = vmax.xlane.f32.xlu1 %v501_v56 }
 0x5a2   :  { %570 = vrot.lane.b32.xlu1 %v1903_v42, %s1775_s21 }
 0x5a6   :  { %620 = vrot.lane.b32.xlu1 %v1901_v39, %s1776_s22 }
 0x5aa   :  { %670 = vrot.lane.b32.xlu1 %v1903_v42, %s1776_s22 }
 0x5ae   :  { %668 = vrot.lane.b32.xlu1 %v1903_v42, %s1777_s23 }
 0x616   :  { %v500_v57 = vpop.xlane.xlu0 %499 }
 0x617   :  { %v504_v58 = vsub.f32 %v496_v47, %v500_v57 }
 0x619   :  { %v506_v59 = vmul.f32 1.442695, %v504_v58 }
 0x61b   :  { %1713 = vpow2.f32 %v506_v59 }
 0x61e   :  { %v503_v60 = vpop.xlane.xlu1 %502 }
 0x61f   :  { %v505_v61 = vsub.f32 %v497_v55, %v503_v60 }
 0x621   :  { %v508_v62 = vmul.f32 1.442695, %v505_v61 }
 0x622   :  { %v571_v63 = vpop.permute.xlu1 %570 }
 0x623   :  { %1715 = vpow2.f32 %v508_v62  ;;  %v576_v2 = vsel %vm302_vm4, %v571_v63, 0 }
 0x624   :  { %1565 = vmatpush3.bf16.msra.mxu0 %v576_v2 }
 0x625   :  { %v1714_v3 = vpop.eup %1713  ;;  %1576 = vmatprep.subr.bf16.mxu0 %v1769_v15 }
 0x626   :  { %v510_v4 = vsel %vm173_vm2, %v1714_v3, 0.0  ;;  %v621_v14 = vpop.permute.xlu1 %620 }
 0x627   :  { %511 = vadd.xlane.f32.xlu0 %v510_v4  ;;  %v626_v19 = vsel %vm173_vm2, %v621_v14, 0 }
 0x62a   :  { %v671_v18 = vpop.permute.xlu1 %670 }
 0x62b   :  { %v676_v21 = vsel %vm173_vm2, %v671_v18, 0 }
 0x62d   :  { %v1716_v5 = vpop.eup %1715 }
 0x62e   :  { %v513_v6 = vsel %vm173_vm2, %v1716_v5, 0.0  ;;  %v669_v23 = vpop.permute.xlu1 %668 }
 0x62f   :  { %514 = vadd.xlane.f32.xlu0 %v513_v6 }
 0x645   :  { %522 = vrot.lane.b32.xlu0 %v1901_v39, %s1775_s21 }
 0x649   :  { %618 = vrot.lane.b32.xlu0 %v1901_v39, %s1777_s23 }
 0x6b4   :  { %v512_v7 = vpop.xlane.xlu0 %511 }
 0x6b5   :  { %1717 = vrcp.f32 %v512_v7 }
 0x6bc   :  { %v515_v8 = vpop.xlane.xlu0 %514 }
 0x6bd   :  { %1719 = vrcp.f32 %v515_v8 }
 0x6bf   :  { %v1718_v9 = vpop.eup %1717 }
 0x6c0   :  { %v518_v10 = vmul.f32 %v1718_v9, %v1714_v3  ;;  %v523_v11 = vpop.permute.xlu0 %522 }
 0x6c1   :  { %v528_v12 = vsel %vm302_vm4, %v523_v11, 0 }
 0x6c2   :  { %1559 = vmatpush3.bf16.msra.mxu1 %v528_v12  ;;  %v520_v13 = vpack.c.bf16 %v518_v10, %v518_v10 }
 0x6c3   :  { %1570 = vmatprep.subr.bf16.mxu1 %v1769_v15 }
 0x6c4   :  { %v619_v22 = vpop.permute.xlu0 %618 }
 0x6c5   :  { %1561 = vmatmul.mubr.msk.bf16.vlgmr.msra.gmra.mrb[8].mxu1 %vm173_vm2, %v520_v13 }
 0x6c6   :  { %1572 = vmatprep.mubr.msk.bf16.mxu1 %vm1770_vm1, %v1769_v15 }
 0x6c7   :  { %v1720_v16 = vpop.eup %1719 }
 0x6c8   :  { %v519_v17 = vmul.f32 %v1720_v16, %v1716_v5 }
 0x6ca   :  { %v521_v20 = vpack.c.bf16 %v519_v17, %v519_v17 }
 0x6cb   :  { %1571 = vmatpush3.bf16.xpose.msra.mxu1 %v626_v19 }
 0x6cc   :  { %1567 = vmatmul.mubr.msk.bf16.vlgmr.msra.gmra.mrb[20].mxu0 %vm173_vm2, %v521_v20  ;;  %1582 = vmatprep.subr.bf16.mxu1 %v1769_v15 }
 0x6cd   :  { %1577 = vmatpush3.bf16.xpose.msra.mxu0 %v676_v21  ;;  %1578 = vmatprep.mubr.msk.bf16.mxu0 %vm1770_vm1, %v1769_v15 }
 0x6ce   :  { %1588 = vmatprep.subr.bf16.mxu0 %v1769_v15 }
 0x6d2   :  { %1573 = vmatmul.mubr.msk.bf16.vlgmr.msra.gmra.mrb[12].mxu1 %vm173_vm2, %v619_v22 }
 0x6d3   :  { %1584 = vmatprep.mubr.msk.bf16.mxu1 %vm1770_vm1, %v1769_v15 }
 0x6d4   :  { %1579 = vmatmul.mubr.msk.bf16.vlgmr.msra.gmra.mrb[24].mxu0 %vm173_vm2, %v669_v23 }
 0x6d5   :  { %1590 = vmatprep.mubr.msk.bf16.mxu0 %vm1770_vm1, %v1769_v15 }
 0x798   :  { %v1990_v24 = vpop.f32.mrb[8].mxu1 }
 0x799   :  { %v1562_v25 = vpop.f32.mrb[9].mxu1 }
 0x79a   :  { %v567_v26 = vpop.f32.mrb[10].mxu1 }
 0x79b   :  { %v1563_v27 = vpop.f32.mrb[11].mxu1 }
 0x79f   :  { %v1992_v28 = vpop.f32.mrb[20].mxu0 }
 0x7a0   :  { %v1672_v29 = vpack.i.bf16 %v1992_v28, %v1990_v24  ;;  %v1568_v30 = vpop.f32.mrb[21].mxu0 }
 0x7a1   :  { %v615_v31 = vpop.f32.mrb[22].mxu0 }
 0x7a2   :  { %v1569_v33 = vpop.f32.mrb[23].mxu0 }
 0x7a5   :  { %v662_v34 = vpop.f32.mrb[12].mxu1 }
 0x7a6   :  { %v718_v35 = vmul.f32 0.35355338, %v662_v34  ;;  %v1574_v37 = vpop.f32.mrb[13].mxu1 }
 0x7a7   :  { %v665_v38 = vpop.f32.mrb[14].mxu1  ;;  %v712_v40 = vpop.f32.mrb[24].mxu0 }
 0x7a8   :  { %v719_v41 = vmul.f32 0.35355338, %v712_v40  ;;  %v1575_v43 = vpop.f32.mrb[15].mxu1  ;;  %v1580_v44 = vpop.f32.mrb[25].mxu0  ;;  %v720_v45 = vadd.f32 %v718_v35, %v1920_v51 }
 0x7a9   :  { %v715_v46 = vpop.f32.mrb[26].mxu0 }
 0x7aa   :  { %v1581_v47 = vpop.f32.mrb[27].mxu0  ;;  %v722_v48 = vsel %vm173_vm2, %v720_v45, -inf  ;;  %v721_v49 = vadd.f32 %v719_v41, %v1920_v51 }
 0x7ab   :  { %723 = vmax.xlane.f32.xlu0 %v722_v48 }
 0x7ac   :  { %v725_v50 = vsel %vm173_vm2, %v721_v49, -inf }
 0x7ad   :  { %726 = vmax.xlane.f32.xlu1 %v725_v50 }
 0x7be   :  { %794 = vrot.lane.b32.xlu1 %v1903_v42, %s1778_s24 }
 0x7c2   :  { %844 = vrot.lane.b32.xlu1 %v1901_v39, %s1779_s25 }
 0x7c6   :  { %894 = vrot.lane.b32.xlu1 %v1903_v42, %s1779_s25 }
 0x7ca   :  { %892 = vrot.lane.b32.xlu1 %v1903_v42, %s1780_s26 }
 0x838   :  { %v724_v52 = vpop.xlane.xlu0 %723 }
 0x839   :  { %v728_v53 = vsub.f32 %v720_v45, %v724_v52 }
 0x83a   :  { %v727_v54 = vpop.xlane.xlu1 %726 }
 0x83b   :  { %v730_v55 = vmul.f32 1.442695, %v728_v53  ;;  %v729_v56 = vsub.f32 %v721_v49, %v727_v54 }
 0x83d   :  { %1721 = vpow2.f32 %v730_v55  ;;  %v732_v57 = vmul.f32 1.442695, %v729_v56 }
 0x83e   :  { %v795_v58 = vpop.permute.xlu1 %794 }
 0x83f   :  { %1723 = vpow2.f32 %v732_v57  ;;  %v800_v59 = vsel %vm302_vm4, %v795_v58, 0 }
 0x840   :  { %1589 = vmatpush3.bf16.msra.mxu0 %v800_v59 }
 0x841   :  { %1600 = vmatprep.subr.bf16.mxu0 %v1769_v15 }
 0x842   :  { %v845_v7 = vpop.permute.xlu1 %844 }
 0x843   :  { %v850_v13 = vsel %vm173_vm2, %v845_v7, 0 }
 0x846   :  { %v895_v12 = vpop.permute.xlu1 %894 }
 0x847   :  { %v1722_v60 = vpop.eup %1721  ;;  %v900_v16 = vsel %vm173_vm2, %v895_v12, 0 }
 0x848   :  { %v734_v61 = vsel %vm173_vm2, %v1722_v60, 0.0 }
 0x849   :  { %v1724_v62 = vpop.eup %1723  ;;  %735 = vadd.xlane.f32.xlu0 %v734_v61 }
 0x84a   :  { %v737_v63 = vsel %vm173_vm2, %v1724_v62, 0.0  ;;  %v893_v18 = vpop.permute.xlu1 %892 }
 0x84d   :  { %738 = vadd.xlane.f32.xlu0 %v737_v63 }
 0x863   :  { %746 = vrot.lane.b32.xlu0 %v1901_v39, %s1778_s24 }
 0x867   :  { %842 = vrot.lane.b32.xlu0 %v1901_v39, %s1780_s26 }
 0x8d6   :  { %v736_v2 = vpop.xlane.xlu0 %735 }
 0x8d7   :  { %1725 = vrcp.f32 %v736_v2 }
 0x8da   :  { %v739_v3 = vpop.xlane.xlu0 %738 }
 0x8db   :  { %1727 = vrcp.f32 %v739_v3 }
 0x8de   :  { %v747_v4 = vpop.permute.xlu0 %746 }
 0x8df   :  { %v752_v5 = vsel %vm302_vm4, %v747_v4, 0  ;;  %v1689_v4 = vld [vmem:[%s2155_s5] sm:$0xff]  }
 0x8e0   :  { %1583 = vmatpush3.bf16.msra.mxu1 %v752_v5  ;;  %v1690_v5 = vld [vmem:[%s2155_s5 + $0x8] sm:$0xff]  }
 0x8e1   :  { %v1726_v6 = vpop.eup %1725  ;;  %1594 = vmatprep.subr.bf16.mxu1 %v1769_v15 }
 0x8e2   :  { %v742_v8 = vmul.f32 %v1726_v6, %v1722_v60  ;;  %v843_v17 = vpop.permute.xlu0 %842 }
 0x8e4   :  { %v744_v9 = vpack.c.bf16 %v742_v8, %v742_v8 }
 0x8e5   :  { %v1728_v10 = vpop.eup %1727 }
 0x8e6   :  { %v743_v11 = vmul.f32 %v1728_v10, %v1724_v62  ;;  %1585 = vmatmul.mubr.msk.bf16.vlgmr.msra.gmra.mrb[16].mxu1 %vm173_vm2, %v744_v9 }
 0x8e7   :  { %1596 = vmatprep.mubr.msk.bf16.mxu1 %vm1770_vm1, %v1769_v15 }
 0x8e8   :  { %v745_v14 = vpack.c.bf16 %v743_v11, %v743_v11 }
 0x8e9   :  { %1595 = vmatpush3.bf16.xpose.msra.mxu1 %v850_v13 }
 0x8ea   :  { %1591 = vmatmul.mubr.msk.bf16.vlgmr.msra.gmra.mrb[28].mxu0 %vm173_vm2, %v745_v14  ;;  %1606 = vmatprep.subr.bf16.mxu1 %v1769_v15 }
 0x8eb   :  { %1601 = vmatpush3.bf16.xpose.msra.mxu0 %v900_v16  ;;  %1602 = vmatprep.mubr.msk.bf16.mxu0 %vm1770_vm1, %v1769_v15 }
 0x8ec   :  { %1612 = vmatprep.subr.bf16.mxu0 %v1769_v15 }
 0x8f0   :  { %1597 = vmatmul.mubr.msk.bf16.vlgmr.msra.gmra.mrb[20].mxu1 %vm173_vm2, %v843_v17 }
 0x8f1   :  { %1608 = vmatprep.mubr.msk.bf16.mxu1 %vm1770_vm1, %v1769_v15 }
 0x8f2   :  { %1603 = vmatmul.mubr.msk.bf16.vlgmr.msra.gmra.mrb[32].mxu0 %vm173_vm2, %v893_v18 }
 0x8f3   :  { %1614 = vmatprep.mubr.msk.bf16.mxu0 %vm1770_vm1, %v1769_v15 }
 0x9b9   :  { %v788_v19 = vpop.f32.mrb[16].mxu1 }
 0x9ba   :  { %v1586_v20 = vpop.f32.mrb[17].mxu1 }
 0x9bb   :  { %v791_v21 = vpop.f32.mrb[18].mxu1 }
 0x9bc   :  { %v1587_v22 = vpop.f32.mrb[19].mxu1 }
 0x9bd   :  { %v836_v23 = vpop.f32.mrb[28].mxu0 }
 0x9be   :  { %v1677_v25 = vpack.i.bf16 %v836_v23, %v788_v19  ;;  %v1592_v26 = vpop.f32.mrb[29].mxu0 }
 0x9bf   :  { %v839_v27 = vpop.f32.mrb[30].mxu0 }
 0x9c0   :  { %v1593_v30 = vpop.f32.mrb[31].mxu0 }
 0x9c3   :  { %v886_v31 = vpop.f32.mrb[20].mxu1 }
 0x9c4   :  { %v942_v33 = vmul.f32 0.35355338, %v886_v31  ;;  %v1598_v34 = vpop.f32.mrb[21].mxu1 }
 0x9c5   :  { %v889_v35 = vpop.f32.mrb[22].mxu1  ;;  %v936_v37 = vpop.f32.mrb[32].mxu0 }
 0x9c6   :  { %v943_v38 = vmul.f32 0.35355338, %v936_v37  ;;  %v1599_v40 = vpop.f32.mrb[23].mxu1  ;;  %v1604_v41 = vpop.f32.mrb[33].mxu0  ;;  %v944_v43 = vadd.f32 %v942_v33, %v1920_v51  ;;  %v1445_v37 = vld [vmem:[%s2156_s6] ss:$0 sm:$0xff] }
 0x9c7   :  { %v939_v44 = vpop.f32.mrb[34].mxu0  ;;  %s1785_s6 = smov [#allocation2]  }
 0x9c8   :  { %v1605_v45 = vpop.f32.mrb[35].mxu0  ;;  %v946_v46 = vsel %vm173_vm2, %v944_v43, -inf  ;;  %v945_v47 = vadd.f32 %v943_v38, %v1920_v51  ;;  %s1412_s17 = sshll.u32 %s1785_s6, 4  ;;  %s1413_s17 = int_to_ptr.vmem [resolvable:$true] %s1412_s17 }
 0x9c9   :  { %947 = vmax.xlane.f32.xlu0 %v946_v46  ;;  %s1745_s18 = scalar_lea.vmem %s1413_s17, 256  ;;  %p1750_p1 = scmp.lt.s32.totalorder %s1413_s17, %s1413_s17 }
 0x9ca   :  { %v949_v48 = vsel %vm173_vm2, %v945_v47, -inf  ;;  %p1746_p0 = scmp.ne.s32.totalorder %s1413_s17, %s1745_s18  ;;  %p1751_p2 = scmp.lt.s32.totalorder %s1745_s18, %s1745_s18 }
 0x9cb   :  { %950 = vmax.xlane.f32.xlu1 %v949_v48 }
 0x9cc   :  { %p1752_p3 = por %p1751_p2, %p1750_p1 }
 0x9ce   :  { %p1753_p4 = pnand %p1752_p3, %p1746_p0 }
 0x9dc   :  { %1018 = vrot.lane.b32.xlu1 %v1903_v42, %s1781_s27 }
 0x9e0   :  { %1673 = vrot.lane.b32.xlu1 %v1672_v29, %s1782_s28 }
 0x9e4   :  { %1678 = vrot.lane.b32.xlu1 %v1677_v25, %s1783_s0 }
 0xa56   :  { %v948_v49 = vpop.xlane.xlu0 %947 }
 0xa57   :  { %v952_v50 = vsub.f32 %v944_v43, %v948_v49 }
 0xa58   :  { %v951_v52 = vpop.xlane.xlu1 %950 }
 0xa59   :  { %v954_v53 = vmul.f32 1.442695, %v952_v50  ;;  %v953_v51 = vsub.f32 %v945_v47, %v951_v52 }
 0xa5b   :  { %1729 = vpow2.f32 %v954_v53  ;;  %v956_v54 = vmul.f32 1.442695, %v953_v51 }
 0xa5c   :  { %v1019_v55 = vpop.permute.xlu1 %1018 }
 0xa5d   :  { %1731 = vpow2.f32 %v956_v54  ;;  %v1024_v56 = vsel %vm302_vm4, %v1019_v55, 0 }
 0xa5e   :  { %1613 = vmatpush3.bf16.msra.mxu0 %v1024_v56  ;;  %v1691_v56 = vld [vmem:[%s2159_s9] sm:$0xff]  }
 0xa5f   :  { %1626 = vmatprep.subr.bf16.mxu0 %v1769_v15 }
 0xa60   :  { %v1674_v16 = vpop.permute.xlu1 %1673 }
 0xa61   :  { %v1676_v18 = vunpack.i.h.bf16 %v1674_v16  ;;  %v1675_v19 = vunpack.i.l.bf16 %v1674_v16  ;;  %v1700_v16 = vld [vmem:[%s2161_s11 + $0x38] sm:$0xff]  }
 0xa63   :  { %v1091_v23 = vsel %vm173_vm2, %v1956_v36, %v1676_v18  ;;  %v1090_v25 = vsel %vm173_vm2, %v1954_v32, %v1675_v19 }
 0xa64   :  { %v1679_v17 = vpop.permute.xlu1 %1678 }
 0xa65   :  { %v1730_v42 = vpop.eup %1729  ;;  %v1681_v20 = vunpack.i.h.bf16 %v1679_v17  ;;  %v1680_v21 = vunpack.i.l.bf16 %v1679_v17  ;;  %v1451_v17 = vld [vmem:[%s2160_s10] ss:$0 sm:$0xff] }
 0xa66   :  { %v958_v24 = vsel %vm173_vm2, %v1730_v42, 0.0 }
 0xa67   :  { %v1732_v28 = vpop.eup %1731  ;;  %959 = vadd.xlane.f32.xlu0 %v958_v24  ;;  %v1093_v30 = vsel %vm1092_vm5, %v1090_v25, %v1680_v21  ;;  %v1094_v31 = vsel %vm1092_vm5, %v1091_v23, %v1681_v20  ;;  %v1693_v24 = vld [vmem:[%s2161_s11] sm:$0xff]  }
 0xa68   :  { %v961_v29 = vsel %vm173_vm2, %v1732_v28, 0.0 }
 0xa6b   :  { %962 = vadd.xlane.f32.xlu0 %v961_v29 }
 0xa81   :  { %970 = vrot.lane.b32.xlu0 %v1901_v39, %s1781_s27 }
 0xaf4   :  { %v960_v57 = vpop.xlane.xlu0 %959 }
 0xaf5   :  { %1733 = vrcp.f32 %v960_v57 }
 0xaf8   :  { %v963_v58 = vpop.xlane.xlu0 %962 }
 0xaf9   :  { %1735 = vrcp.f32 %v963_v58 }
 0xafc   :  { %v971_v59 = vpop.permute.xlu0 %970 }
 0xafd   :  { %v976_v60 = vsel %vm302_vm4, %v971_v59, 0 }
 0xafe   :  { %1607 = vmatpush3.bf16.msra.mxu1 %v976_v60 }
 0xaff   :  { %v1734_v61 = vpop.eup %1733  ;;  %1618 = vmatprep.subr.bf16.mxu1 %v1769_v15 }
 0xb00   :  { %v966_v62 = vmul.f32 %v1734_v61, %v1730_v42  ;;  %v1692_v42 = vld [vmem:[%s2159_s9 + $0x8] sm:$0xff]  }
 0xb02   :  { %v968_v63 = vpack.c.bf16 %v966_v62, %v966_v62 }
 0xb03   :  { %v1736_v2 = vpop.eup %1735 }
 0xb04   :  { %v967_v3 = vmul.f32 %v1736_v2, %v1732_v28  ;;  %1609 = vmatmul.mubr.msk.bf16.vlgmr.msra.gmra.mrb[24].mxu1 %vm173_vm2, %v968_v63  ;;  %v1694_v28 = vld [vmem:[%s2161_s11 + $0x8] sm:$0xff]   ;;  %v1449_v2 = vld [vmem:[%s2157_s7] ss:$0 sm:$0xff] }
 0xb05   :  { %1622 = vmatprep.mubr.msk.bf16.mxu1 %vm1770_vm1, %v1769_v15  ;;  %1619 = vmatpush3.bf16.msra.mxu1 %v1689_v4 }
 0xb06   :  { %v969_v39 = vpack.c.bf16 %v967_v3, %v967_v3  ;;  %1620 = vmatprep.subr.bf16.mxu1 %v1769_v15 }
 0xb08   :  { %1615 = vmatmul.mubr.msk.bf16.vlgmr.msra.gmra.mrb[36].mxu0 %vm173_vm2, %v969_v39 }
 0xb09   :  { %1630 = vmatprep.mubr.msk.bf16.mxu0 %vm1770_vm1, %v1769_v15  ;;  %1621 = vmatpush3.bf16.msra.mxu1 %v1690_v5  ;;  %v1450_v5 = vld [vmem:[%s2158_s8] ss:$0 sm:$0xff] }
 0xb0a   :  { %1634 = vmatprep.subr.bf16.mxu1 %v1769_v15  ;;  %1627 = vmatpush3.bf16.msra.mxu0 %v1691_v56 }
 0xb0b   :  { %1628 = vmatprep.subr.bf16.mxu0 %v1769_v15 }
 0xb0e   :  { %1629 = vmatpush3.bf16.msra.mxu0 %v1692_v42 }
 0xbd7   :  { %v1012_v6 = vpop.f32.mrb[24].mxu1 }
 0xbd8   :  { %v1610_v7 = vpop.f32.mrb[25].mxu1 }
 0xbd9   :  { %v1015_v8 = vpop.f32.mrb[26].mxu1 }
 0xbda   :  { %v1611_v9 = vpop.f32.mrb[27].mxu1 }
 0xbdb   :  { %v1060_v10 = vpop.f32.mrb[36].mxu0 }
 0xbdc   :  { %v1682_v11 = vpack.i.bf16 %v1060_v10, %v1012_v6  ;;  %v1616_v12 = vpop.f32.mrb[37].mxu0  ;;  %v1695_v10 = vld [vmem:[%s2161_s11 + $0x10] sm:$0xff]  }
 0xbdd   :  { %v1063_v13 = vpop.f32.mrb[38].mxu0  ;;  %v1697_v12 = vld [vmem:[%s2161_s11 + $0x20] sm:$0xff]  }
 0xbde   :  { %1683 = vrot.lane.b32.xlu0 %v1682_v11, %s1784_s15  ;;  %v1617_v14 = vpop.f32.mrb[39].mxu0  ;;  %v1696_v11 = vld [vmem:[%s2161_s11 + $0x18] sm:$0xff]   ;;  %v1698_v13 = vld [vmem:[%s2161_s11 + $0x28] sm:$0xff]  }
 0xbdf   :  { %v1699_v14 = vld [vmem:[%s2161_s11 + $0x30] sm:$0xff]  }
 0xc50   :  { %v1684_v22 = vpop.permute.xlu0 %1683 }
 0xc51   :  { %v1686_v26 = vunpack.i.h.bf16 %v1684_v22  ;;  %v1685_v27 = vunpack.i.l.bf16 %v1684_v22 }
 0xc53   :  { %v1097_v33 = vsel %vm1095_vm6, %v1094_v31, %v1686_v26  ;;  %v1096_v34 = vsel %vm1095_vm6, %v1093_v30, %v1685_v27 }
 0xc54   :  { %v1098_v35 = vpack.c.bf16 %v1097_v33, %v1096_v34 }
 0xc56   :  { %1623 = vmatmul.mubr.msk.bf16.vlgmr.msra.gmra.mrb[28].mxu1 %vm50_vm0, %v1098_v35 }
 0xc57   :  { %1650 = vmatprep.mubr.msk.bf16.mxu1 %vm1770_vm1, %v1769_v15  ;;  %1635 = vmatpush3.bf16.msra.mxu1 %v1693_v24 }
 0xc58   :  { %1636 = vmatprep.subr.bf16.mxu1 %v1769_v15 }
 0xc5b   :  { %1637 = vmatpush3.bf16.msra.mxu1 %v1694_v28 }
 0xc5c   :  { %1638 = vmatprep.subr.bf16.mxu1 %v1769_v15 }
 0xc5f   :  { %1639 = vmatpush3.bf16.msra.mxu1 %v1695_v10 }
 0xc60   :  { %1640 = vmatprep.subr.bf16.mxu1 %v1769_v15 }
 0xc63   :  { %1641 = vmatpush3.bf16.msra.mxu1 %v1696_v11 }
 0xc64   :  { %1642 = vmatprep.subr.bf16.mxu1 %v1769_v15 }
 0xc67   :  { %1643 = vmatpush3.bf16.msra.mxu1 %v1697_v12 }
 0xc68   :  { %1644 = vmatprep.subr.bf16.mxu1 %v1769_v15 }
 0xc6b   :  { %1645 = vmatpush3.bf16.msra.mxu1 %v1698_v13 }
 0xc6c   :  { %1646 = vmatprep.subr.bf16.mxu1 %v1769_v15 }
 0xc6f   :  { %1647 = vmatpush3.bf16.msra.mxu1 %v1699_v14 }
 0xc70   :  { %1648 = vmatprep.subr.bf16.mxu1 %v1769_v15 }
 0xc73   :  { %1649 = vmatpush3.bf16.msra.mxu1 %v1700_v16 }
 0xd29   :  { %v1159_v36 = vpop.f32.mrb[28].mxu1 }
 0xd2a   :  { %v1160_v38 = vadd.f32 %v1445_v37, %v1159_v36  ;;  %v1624_v40 = vpop.f32.mrb[29].mxu1 }
 0xd2b   :  { %v1162_v32 = vpop.f32.mrb[30].mxu1 }
 0xd2c   :  { %v2069_v41 = vadd.f32 %v1160_v38, %v1860_v0  ;;  %v1163_v43 = vadd.f32 %v1445_v37, %v1162_v32  ;;  %v1625_v44 = vpop.f32.mrb[31].mxu1  ;;  %v1455_v38 = vld [vmem:[%s2162_s12] ss:$0 sm:$0xff] }
 0xd2e   :  { %v2072_v45 = vadd.f32 %v1163_v43, %v1865_v1  ;;  %v1170_v46 = vsel %vm50_vm0, %v2069_v41, 0.0 }
 0xd2f   :  { %1171 = vadd.xlane.f32.xlu1 %v1170_v46 }
 0xd30   :  { %v1173_v47 = vsel %vm50_vm0, %v2072_v45, 0.0 }
 0xd31   :  { %1174 = vadd.xlane.f32.xlu0 %v1173_v47 }
 0xdbc   :  { %v1172_v48 = vpop.xlane.xlu1 %1171 }
 0xdbd   :  { %v1176_v49 = vmul.f32 0.03125, %v1172_v48 }
 0xdbe   :  { %v1175_v50 = vpop.xlane.xlu0 %1174 }
 0xdbf   :  { %v1178_v52 = vsub.f32 %v2069_v41, %v1176_v49  ;;  %v1177_v0 = vmul.f32 0.03125, %v1175_v50 }
 0xdc1   :  { %v1179_v53 = vsub.f32 %v2072_v45, %v1177_v0  ;;  %v1180_v51 = vmul.f32 %v1178_v52, %v1178_v52 }
 0xdc3   :  { %v1182_v1 = vsel %vm50_vm0, %v1180_v51, 0.0  ;;  %v1181_v54 = vmul.f32 %v1179_v53, %v1179_v53 }
 0xdc4   :  { %1183 = vadd.xlane.f32.xlu0 %v1182_v1 }
 0xdc5   :  { %v1185_v55 = vsel %vm50_vm0, %v1181_v54, 0.0 }
 0xdc8   :  { %1186 = vadd.xlane.f32.xlu0 %v1185_v55 }
 0xe51   :  { %v1184_v29 = vpop.xlane.xlu0 %1183 }
 0xe52   :  { %v1188_v57 = vmul.f32 0.03125, %v1184_v29 }
 0xe54   :  { %v1190_v58 = vadd.f32 1e-05, %v1188_v57 }
 0xe55   :  { %v1187_v59 = vpop.xlane.xlu0 %1186 }
 0xe56   :  { %1737 = vrsqrt.f32 %v1190_v58  ;;  %v1189_v60 = vmul.f32 0.03125, %v1187_v59 }
 0xe58   :  { %v1191_v61 = vadd.f32 1e-05, %v1189_v60 }
 0xe5a   :  { %1739 = vrsqrt.f32 %v1191_v61 }
 0xe60   :  { %v1738_v62 = vpop.eup %1737 }
 0xe61   :  { %v1194_v63 = vmul.f32 %v1738_v62, %v1178_v52 }
 0xe63   :  { %v1202_v39 = vmul.f32 %v1449_v2, %v1194_v63 }
 0xe64   :  { %v1740_v3 = vpop.eup %1739 }
 0xe65   :  { %v1195_v4 = vmul.f32 %v1740_v3, %v1179_v53  ;;  %v1210_v7 = vadd.f32 %v1450_v5, %v1202_v39 }
 0xe67   :  { %v1203_v6 = vmul.f32 %v1449_v2, %v1195_v4 }
 0xe69   :  { %v1211_v8 = vadd.f32 %v1450_v5, %v1203_v6 }
 0xe6b   :  { %v1212_v9 = vpack.c.bf16 %v1211_v8, %v1210_v7 }
 0xe6d   :  { %1631 = vmatmul.mubr.msk.bf16.vlgmr.msra.gmra.mrb[40].mxu0 %vm50_vm0, %v1212_v9 }
 0xf40   :  { %v1273_v18 = vpop.f32.mrb[40].mxu0 }
 0xf41   :  { %v1274_v19 = vadd.f32 %v1451_v17, %v1273_v18  ;;  %v1632_v20 = vpop.f32.mrb[41].mxu0 }
 0xf42   :  { %v1276_v21 = vpop.f32.mrb[42].mxu0 }
 0xf43   :  { %v1282_v22 = vmul.f32 0.70710677, %v1274_v19  ;;  %v1277_v23 = vadd.f32 %v1451_v17, %v1276_v21  ;;  %v1633_v25 = vpop.f32.mrb[43].mxu0  ;;  %v1280_v31 = vmul.f32 0.5, %v1274_v19 }
 0xf45   :  { %1741 = verf.f32 %v1282_v22  ;;  %v1283_v26 = vmul.f32 0.70710677, %v1277_v23  ;;  %v1281_v33 = vmul.f32 0.5, %v1277_v23 }
 0xf47   :  { %1743 = verf.f32 %v1283_v26 }
 0xf4f   :  { %v1742_v15 = vpop.eup %1741 }
 0xf50   :  { %v1286_v27 = vadd.f32 1.0, %v1742_v15 }
 0xf51   :  { %v1744_v30 = vpop.eup %1743 }
 0xf52   :  { %v1287_v34 = vadd.f32 1.0, %v1744_v30  ;;  %v1288_v35 = vmul.f32 %v1286_v27, %v1280_v31 }
 0xf54   :  { %v1289_v37 = vmul.f32 %v1287_v34, %v1281_v33 }
 0xf56   :  { %v1290_v36 = vpack.c.bf16 %v1289_v37, %v1288_v35 }
 0xf58   :  { %1651 = vmatmul.mubr.bf16.vlgmr.msra.gmra.mrb[32].mxu1 %v1290_v36 }
0x102b   :  { %v1396_v40 = vpop.f32.mrb[32].mxu1 }
0x102c   :  { %v1397_v32 = vadd.f32 %v1455_v38, %v1396_v40  ;;  %v1652_v43 = vpop.f32.mrb[33].mxu1 }
0x102d   :  { %v1399_v44 = vpop.f32.mrb[34].mxu1 }
0x102e   :  { %v1403_v46 = vadd.f32 %v1397_v32, %v2069_v41  ;;  %v1400_v47 = vadd.f32 %v1455_v38, %v1399_v44  ;;  %v1653_v48 = vpop.f32.mrb[35].mxu1 }
0x1030   :  { %1405 = vst.msk [vmem:[#allocation2] sm:$0xff] %vm50_vm0, %v1403_v46  ;;  %v1404_v49 = vadd.f32 %v1400_v47, %v2072_v45 }
0x1032   :  { %1406 = vst.msk [vmem:[#allocation2 + $0x8] sm:$0xff] %vm50_vm0, %v1404_v49 }
0x1033   :  { %1756 = shalt.err (!%p1753_p4)
}
0x1034   :  { %s1757_s1 = scalar_lea.hbm %s2163_s13, 256 }
0x1035   :  { %p1758_p5 = scmp.ne.s32.totalorder %s2163_s13, %s1757_s1  ;;  %p1761_p6 = scmp.lt.u32.totalorder %s1757_s1, %s2163_s13 }
0x1037   :  { %p1763_p7 = pnand %p1761_p6, %p1758_p5 }
0x1039   :  { %1766 = shalt.err (!%p1763_p7)
}
0x103a   :  { %s1786_s21 = smov 128  }
0x103b   :  { %1418 = dma.vmem_to_hbm [thread:$0]  %s1413_s17, 256, %s2163_s13, [#allocation3], %s1786_s21, %s1786_s21, %s1782_s28  }
0x103c   :  { %1767 = dma.done.wait [#allocation3], 256  }
0x103d   :  { %1768 = vsyncadd [#allocation3], 4294967040 }
0x103e   :  { %1422 = vsyncpa [#allocation3], 1 }

// kernel: tpu_custom_call.1
= control target key start
LH: loop header
LB: loop body
LE: loop exit
PB: predicated region body
PF: predicated region fallthrough
CT: control target
= control target key end

     0   :  { %vm50_vm0 = vcmask 261120   ;;  %s2150_s0 = inlined_call_operand.vmem [shape: f32[2,8,32], index: 0, kind: input, shape index: {}]   ;;  %s2151_s1 = inlined_call_operand.vmem [shape: f32[1,32], index: 1, kind: input, shape index: {}]   ;;  %s2152_s2 = inlined_call_operand.vmem [shape: f32[1,32], index: 2, kind: input, shape index: {}]   ;;  %s2153_s3 = inlined_call_operand.vmem [shape: bf16[32,96], index: 3, kind: input, shape index: {}]   ;;  %s2154_s4 = inlined_call_operand.vmem [shape: f32[1,96], index: 4, kind: input, shape index: {}]   ;;  %s2155_s5 = inlined_call_operand.vmem [shape: bf16[32,32], index: 5, kind: input, shape index: {}]   ;;  %s2156_s6 = inlined_call_operand.vmem [shape: f32[1,32], index: 6, kind: input, shape index: {}]   ;;  %s2157_s7 = inlined_call_operand.vmem [shape: f32[1,32], index: 7, kind: input, shape index: {}]   ;;  %s2158_s8 = inlined_call_operand.vmem [shape: f32[1,32], index: 8, kind: input, shape index: {}]   ;;  %s2159_s9 = inlined_call_operand.vmem [shape: bf16[32,128], index: 9, kind: input, shape index: {}]   ;;  %s2160_s10 = inlined_call_operand.vmem [shape: f32[1,128], index: 10, kind: input, shape index: {}]   ;;  %s2161_s11 = inlined_call_operand.vmem [shape: bf16[128,32], index: 11, kind: input, shape index: {}]   ;;  %s2162_s12 = inlined_call_operand.vmem [shape: f32[1,32], index: 12, kind: input, shape index: {}]   ;;  %s2163_s13 = inlined_call_operand.hbm [shape: f32[2,8,32], index: 13, kind: output, shape index: {}]  }
   0x1   :  { %v1860_v0 = vld [vmem:[%s2150_s0] sm:$0xff]  ;;  %v1865_v1 = vld [vmem:[%s2150_s0 + $0x8] sm:$0xff] }
   0x2   :  { %v51_v2 = vsel %vm50_vm0, %v1860_v0, 0.0  ;;  %v54_v3 = vsel %vm50_vm0, %v1865_v1, 0.0 }
   0x3   :  { %52 = vadd.xlane.f32.xlu0 %v51_v2 }
   0x7   :  { %55 = vadd.xlane.f32.xlu0 %v54_v3 }
   0x8   :  { %18 = vsyncpa [#allocation3], 0  ;;  %v1687_v14 = vld [vmem:[%s2153_s3] sm:$0xff]   ;;  %v1769_v15 = vmov 0.0   ;;  %v1688_v16 = vld [vmem:[%s2153_s3 + $0x8] sm:$0xff]   ;;  %vm1770_vm1 = vmmov 0   ;;  %v164_v47 = vlaneseq }
   0x9   :  { %1514 = vmatprep.subr.bf16.mxu0 %v1769_v15  ;;  %1534 = vmatprep.subr.bf16.mxu1 %v1769_v15  ;;  %v1423_v25 = vld [vmem:[%s2151_s1] ss:$0 sm:$0xff]  ;;  %s1771_s1 = smov 96   ;;  %vm173_vm2 = vcmask 64512   ;;  %vm302_vm4 = vcmask 1043456   ;;  %s1774_s20 = smov 120  }
   0xa   :  { %1515 = vmatpush3.bf16.msra.mxu0 %v1687_v14  ;;  %1518 = vmatprep.mubr.msk.bf16.mxu0 %vm1770_vm1, %v1769_v15  ;;  %v1424_v29 = vld [vmem:[%s2152_s2] ss:$0 sm:$0xff]  ;;  %v165_v48 = vshrl.u32 %v164_v47, 7  ;;  %v167_v49 = vand.u32 127, %v164_v47  ;;  %s1772_s2 = smov 64   ;;  %s1775_s21 = smov 56  }
   0xb   :  { %1516 = vmatprep.subr.bf16.mxu0 %v1769_v15  ;;  %1536 = vmatprep.mubr.msk.bf16.mxu1 %vm1770_vm1, %v1769_v15  ;;  %v1425_v34 = vld [vmem:[%s2154_s4] ss:$0 sm:$0xff]  ;;  %s1773_s4 = smov 88   ;;  %s1776_s22 = smov 80   ;;  %vm1092_vm5 = vcmask 130048   ;;  %vm1095_vm6 = vcmask 195584  }
   0xc   :  { %vm168_vm3 = vcmp.gt.s32.totalorder %v167_v49, %v165_v48  ;;  %s1777_s23 = smov 112   ;;  %s1778_s24 = smov 48  }
   0xd   :  { %v1920_v51 = vsel %vm168_vm3, -inf, %v1769_v15  ;;  %s1779_s25 = smov 72   ;;  %s1780_s26 = smov 104  }
   0xe   :  { %1517 = vmatpush3.bf16.msra.mxu0 %v1688_v16  ;;  %s1781_s27 = smov 40   ;;  %s1782_s28 = smov 8  }
   0xf   :  { %1522 = vmatprep.subr.bf16.mxu0 %v1769_v15  ;;  %s1783_s0 = smov 16   ;;  %s1784_s15 = smov 24  }
  0x90   :  { %v53_v4 = vpop.xlane.xlu0 %52 }
  0x91   :  { %v58_v5 = vmul.f32 0.03125, %v53_v4 }
  0x93   :  { %v60_v6 = vsub.f32 %v1860_v0, %v58_v5 }
  0x94   :  { %v56_v7 = vpop.xlane.xlu0 %55 }
  0x95   :  { %v59_v8 = vmul.f32 0.03125, %v56_v7  ;;  %v62_v9 = vmul.f32 %v60_v6, %v60_v6 }
  0x97   :  { %v61_v10 = vsub.f32 %v1865_v1, %v59_v8  ;;  %v64_v11 = vsel %vm50_vm0, %v62_v9, 0.0 }
  0x98   :  { %65 = vadd.xlane.f32.xlu1 %v64_v11 }
  0x99   :  { %v63_v12 = vmul.f32 %v61_v10, %v61_v10 }
  0x9b   :  { %v67_v13 = vsel %vm50_vm0, %v63_v12, 0.0 }
  0x9c   :  { %68 = vadd.xlane.f32.xlu1 %v67_v13 }
 0x125   :  { %v66_v17 = vpop.xlane.xlu1 %65 }
 0x126   :  { %v70_v18 = vmul.f32 0.03125, %v66_v17 }
 0x128   :  { %v72_v19 = vadd.f32 1e-05, %v70_v18 }
 0x129   :  { %v69_v20 = vpop.xlane.xlu1 %68 }
 0x12a   :  { %1701 = vrsqrt.f32 %v72_v19  ;;  %v71_v21 = vmul.f32 0.03125, %v69_v20 }
 0x12c   :  { %v73_v22 = vadd.f32 1e-05, %v71_v21 }
 0x12e   :  { %1703 = vrsqrt.f32 %v73_v22 }
 0x134   :  { %v1702_v23 = vpop.eup %1701 }
 0x135   :  { %v76_v24 = vmul.f32 %v1702_v23, %v60_v6 }
 0x137   :  { %v84_v28 = vmul.f32 %v1423_v25, %v76_v24 }
 0x138   :  { %v1704_v26 = vpop.eup %1703 }
 0x139   :  { %v77_v27 = vmul.f32 %v1704_v26, %v61_v10  ;;  %v92_v31 = vadd.f32 %v1424_v29, %v84_v28 }
 0x13b   :  { %v85_v30 = vmul.f32 %v1423_v25, %v77_v27 }
 0x13d   :  { %v93_v32 = vadd.f32 %v1424_v29, %v85_v30 }
 0x13f   :  { %v94_v33 = vpack.c.bf16 %v93_v32, %v92_v31 }
 0x141   :  { %1519 = vmatmul.mubr.msk.bf16.vlgmr.msra.gmra.mrb[0].mxu0 %vm50_vm0, %v94_v33 }
 0x142   :  { %1524 = vmatprep.mubr.msk.bf16.mxu0 %vm1770_vm1, %v1769_v15 }
 0x214   :  { %v155_v35 = vpop.f32.mrb[0].mxu0 }
 0x215   :  { %v156_v36 = vadd.f32 %v1425_v34, %v155_v35  ;;  %v1520_v37 = vpop.f32.mrb[1].mxu0 }
 0x216   :  { %v158_v38 = vpop.f32.mrb[2].mxu0 }
 0x217   :  { %v1901_v39 = vpack.c.bf16 %v156_v36, %v156_v36  ;;  %v159_v40 = vadd.f32 %v1425_v34, %v158_v38  ;;  %v1521_v41 = vpop.f32.mrb[3].mxu0 }
 0x219   :  { %v1903_v42 = vpack.c.bf16 %v159_v40, %v159_v40  ;;  %171 = vrot.lane.b32.xlu0 %v1901_v39, %s1771_s1 }
 0x21b   :  { %221 = vrot.lane.b32.xlu1 %v1903_v42, %s1771_s1 }
 0x28b   :  { %v172_v43 = vpop.permute.xlu0 %171 }
 0x28c   :  { %v178_v44 = vsel %vm173_vm2, %v172_v43, 0 }
 0x28d   :  { %1523 = vmatpush3.bf16.xpose.msra.mxu0 %v178_v44  ;;  %v222_v45 = vpop.permute.xlu1 %221 }
 0x28e   :  { %1528 = vmatprep.subr.bf16.mxu0 %v1769_v15  ;;  %v227_v46 = vsel %vm173_vm2, %v222_v45, 0 }
 0x294   :  { %1525 = vmatmul.mubr.msk.bf16.vlgmr.msra.gmra.mrb[4].mxu0 %vm173_vm2, %v1901_v39 }
 0x295   :  { %1529 = vmatpush3.bf16.xpose.msra.mxu0 %v227_v46  ;;  %1530 = vmatprep.mubr.msk.bf16.mxu0 %vm1770_vm1, %v1769_v15 }
 0x296   :  { %1540 = vmatprep.subr.bf16.mxu0 %v1769_v15 }
 0x29c   :  { %1531 = vmatmul.mubr.msk.bf16.vlgmr.msra.gmra.mrb[8].mxu0 %vm173_vm2, %v1903_v42 }
 0x29d   :  { %1542 = vmatprep.mubr.msk.bf16.mxu0 %vm1770_vm1, %v1769_v15 }
 0x367   :  { %v214_v50 = vpop.f32.mrb[4].mxu0 }
 0x368   :  { %v269_v52 = vmul.f32 0.35355338, %v214_v50  ;;  %v1526_v53 = vpop.f32.mrb[5].mxu0 }
 0x369   :  { %v217_v54 = vpop.f32.mrb[6].mxu0 }
 0x36a   :  { %v1527_v55 = vpop.f32.mrb[7].mxu0  ;;  %v271_v56 = vadd.f32 %v269_v52, %v1920_v51 }
 0x36c   :  { %v273_v57 = vsel %vm173_vm2, %v271_v56, -inf }
 0x36d   :  { %274 = vmax.xlane.f32.xlu1 %v273_v57 }
 0x36f   :  { %v263_v58 = vpop.f32.mrb[8].mxu0 }
 0x370   :  { %v270_v59 = vmul.f32 0.35355338, %v263_v58  ;;  %v1532_v60 = vpop.f32.mrb[9].mxu0 }
 0x371   :  { %v266_v61 = vpop.f32.mrb[10].mxu0 }
 0x372   :  { %v1533_v62 = vpop.f32.mrb[11].mxu0  ;;  %v272_v63 = vadd.f32 %v270_v59, %v1920_v51 }
 0x374   :  { %v276_v2 = vsel %vm173_vm2, %v272_v63, -inf }
 0x375   :  { %277 = vmax.xlane.f32.xlu0 %v276_v2 }
 0x37e   :  { %346 = vrot.lane.b32.xlu1 %v1903_v42, %s1772_s2 }
 0x382   :  { %396 = vrot.lane.b32.xlu1 %v1901_v39, %s1773_s4 }
 0x3fa   :  { %v275_v3 = vpop.xlane.xlu1 %274 }
 0x3fb   :  { %v279_v4 = vsub.f32 %v271_v56, %v275_v3 }
 0x3fd   :  { %v281_v5 = vmul.f32 1.442695, %v279_v4 }
 0x3fe   :  { %v347_v6 = vpop.permute.xlu1 %346 }
 0x3ff   :  { %1705 = vpow2.f32 %v281_v5  ;;  %v352_v7 = vsel %vm302_vm4, %v347_v6, 0 }
 0x400   :  { %1541 = vmatpush3.bf16.msra.mxu0 %v352_v7 }
 0x401   :  { %1552 = vmatprep.subr.bf16.mxu0 %v1769_v15 }
 0x402   :  { %v278_v8 = vpop.xlane.xlu0 %277  ;;  %v397_v17 = vpop.permute.xlu1 %396 }
 0x403   :  { %v280_v9 = vsub.f32 %v272_v63, %v278_v8  ;;  %v402_v24 = vsel %vm173_vm2, %v397_v17, 0 }
 0x405   :  { %v283_v10 = vmul.f32 1.442695, %v280_v9 }
 0x407   :  { %1707 = vpow2.f32 %v283_v10 }
 0x409   :  { %v1706_v11 = vpop.eup %1705 }
 0x40a   :  { %v285_v12 = vsel %vm173_vm2, %v1706_v11, 0.0 }
 0x40b   :  { %286 = vadd.xlane.f32.xlu0 %v285_v12 }
 0x411   :  { %v1708_v13 = vpop.eup %1707 }
 0x412   :  { %v288_v14 = vsel %vm173_vm2, %v1708_v13, 0.0 }
 0x413   :  { %289 = vadd.xlane.f32.xlu1 %v288_v14 }
 0x421   :  { %297 = vrot.lane.b32.xlu0 %v1901_v39, %s1772_s2 }
 0x424   :  { %446 = vrot.lane.b32.xlu1 %v1903_v42, %s1773_s4 }
 0x425   :  { %394 = vrot.lane.b32.xlu0 %v1901_v39, %s1774_s20 }
 0x428   :  { %444 = vrot.lane.b32.xlu1 %v1903_v42, %s1774_s20 }
 0x498   :  { %v287_v16 = vpop.xlane.xlu0 %286 }
 0x499   :  { %1709 = vrcp.f32 %v287_v16 }
 0x49c   :  { %v298_v18 = vpop.permute.xlu0 %297 }
 0x49d   :  { %v304_v19 = vsel %vm302_vm4, %v298_v18, 0 }
 0x49e   :  { %1535 = vmatpush3.bf16.msra.mxu1 %v304_v19 }
 0x49f   :  { %1546 = vmatprep.subr.bf16.mxu1 %v1769_v15 }
 0x4a0   :  { %v290_v20 = vpop.xlane.xlu1 %289  ;;  %v395_v29 = vpop.permute.xlu0 %394 }
 0x4a1   :  { %1711 = vrcp.f32 %v290_v20 }
 0x4a3   :  { %v1710_v21 = vpop.eup %1709 }
 0x4a4   :  { %v293_v22 = vmul.f32 %v1710_v21, %v1706_v11  ;;  %v447_v27 = vpop.permute.xlu1 %446 }
 0x4a5   :  { %v452_v30 = vsel %vm173_vm2, %v447_v27, 0 }
 0x4a6   :  { %v295_v23 = vpack.c.bf16 %v293_v22, %v293_v22 }
 0x4a8   :  { %1537 = vmatmul.mubr.msk.bf16.vlgmr.msra.gmra.mrb[0].mxu1 %vm173_vm2, %v295_v23  ;;  %v445_v31 = vpop.permute.xlu1 %444 }
 0x4a9   :  { %1547 = vmatpush3.bf16.xpose.msra.mxu1 %v402_v24  ;;  %1548 = vmatprep.mubr.msk.bf16.mxu1 %vm1770_vm1, %v1769_v15 }
 0x4aa   :  { %1558 = vmatprep.subr.bf16.mxu1 %v1769_v15 }
 0x4ab   :  { %v1712_v25 = vpop.eup %1711 }
 0x4ac   :  { %v294_v26 = vmul.f32 %v1712_v25, %v1708_v13 }
 0x4ae   :  { %v296_v28 = vpack.c.bf16 %v294_v26, %v294_v26 }
 0x4b0   :  { %1543 = vmatmul.mubr.msk.bf16.vlgmr.msra.gmra.mrb[12].mxu0 %vm173_vm2, %v296_v28  ;;  %1549 = vmatmul.mubr.msk.bf16.vlgmr.msra.gmra.mrb[4].mxu1 %vm173_vm2, %v395_v29 }
 0x4b1   :  { %1553 = vmatpush3.bf16.xpose.msra.mxu0 %v452_v30  ;;  %1554 = vmatprep.mubr.msk.bf16.mxu0 %vm1770_vm1, %v1769_v15 }
 0x4b2   :  { %1564 = vmatprep.subr.bf16.mxu0 %v1769_v15  ;;  %1560 = vmatprep.mubr.msk.bf16.mxu1 %vm1770_vm1, %v1769_v15 }
 0x4b8   :  { %1555 = vmatmul.mubr.msk.bf16.vlgmr.msra.gmra.mrb[16].mxu0 %vm173_vm2, %v445_v31 }
 0x4b9   :  { %1566 = vmatprep.mubr.msk.bf16.mxu0 %vm1770_vm1, %v1769_v15 }
 0x57b   :  { %v1954_v32 = vpop.f32.mrb[0].mxu1 }
 0x57c   :  { %v1538_v33 = vpop.f32.mrb[1].mxu1 }
 0x57d   :  { %v343_v34 = vpop.f32.mrb[2].mxu1 }
 0x57e   :  { %v1539_v35 = vpop.f32.mrb[3].mxu1 }
 0x583   :  { %v1956_v36 = vpop.f32.mrb[12].mxu0  ;;  %v438_v37 = vpop.f32.mrb[4].mxu1 }
 0x584   :  { %v494_v38 = vmul.f32 0.35355338, %v438_v37  ;;  %v1544_v40 = vpop.f32.mrb[13].mxu0  ;;  %v1550_v41 = vpop.f32.mrb[5].mxu1 }
 0x585   :  { %v391_v43 = vpop.f32.mrb[14].mxu0  ;;  %v441_v44 = vpop.f32.mrb[6].mxu1 }
 0x586   :  { %v1545_v45 = vpop.f32.mrb[15].mxu0  ;;  %v1551_v46 = vpop.f32.mrb[7].mxu1  ;;  %v496_v47 = vadd.f32 %v494_v38, %v1920_v51 }
 0x588   :  { %v498_v48 = vsel %vm173_vm2, %v496_v47, -inf }
 0x589   :  { %499 = vmax.xlane.f32.xlu0 %v498_v48 }
 0x58b   :  { %v488_v49 = vpop.f32.mrb[16].mxu0 }
 0x58c   :  { %v495_v50 = vmul.f32 0.35355338, %v488_v49  ;;  %v1556_v52 = vpop.f32.mrb[17].mxu0 }
 0x58d   :  { %v491_v53 = vpop.f32.mrb[18].mxu0 }
 0x58e   :  { %v1557_v54 = vpop.f32.mrb[19].mxu0  ;;  %v497_v55 = vadd.f32 %v495_v50, %v1920_v51 }
 0x590   :  { %v501_v56 = vsel %vm173_vm2, %v497_v55, -inf }
 0x591   :  { %502 = vmax.xlane.f32.xlu1 %v501_v56 }
 0x5a2   :  { %570 = vrot.lane.b32.xlu1 %v1903_v42, %s1775_s21 }
 0x5a6   :  { %620 = vrot.lane.b32.xlu1 %v1901_v39, %s1776_s22 }
 0x5aa   :  { %670 = vrot.lane.b32.xlu1 %v1903_v42, %s1776_s22 }
 0x5ae   :  { %668 = vrot.lane.b32.xlu1 %v1903_v42, %s1777_s23 }
 0x616   :  { %v500_v57 = vpop.xlane.xlu0 %499 }
 0x617   :  { %v504_v58 = vsub.f32 %v496_v47, %v500_v57 }
 0x619   :  { %v506_v59 = vmul.f32 1.442695, %v504_v58 }
 0x61b   :  { %1713 = vpow2.f32 %v506_v59 }
 0x61e   :  { %v503_v60 = vpop.xlane.xlu1 %502 }
 0x61f   :  { %v505_v61 = vsub.f32 %v497_v55, %v503_v60 }
 0x621   :  { %v508_v62 = vmul.f32 1.442695, %v505_v61 }
 0x622   :  { %v571_v63 = vpop.permute.xlu1 %570 }
 0x623   :  { %1715 = vpow2.f32 %v508_v62  ;;  %v576_v2 = vsel %vm302_vm4, %v571_v63, 0 }
 0x624   :  { %1565 = vmatpush3.bf16.msra.mxu0 %v576_v2 }
 0x625   :  { %v1714_v3 = vpop.eup %1713  ;;  %1576 = vmatprep.subr.bf16.mxu0 %v1769_v15 }
 0x626   :  { %v510_v4 = vsel %vm173_vm2, %v1714_v3, 0.0  ;;  %v621_v14 = vpop.permute.xlu1 %620 }
 0x627   :  { %511 = vadd.xlane.f32.xlu0 %v510_v4  ;;  %v626_v19 = vsel %vm173_vm2, %v621_v14, 0 }
 0x62a   :  { %v671_v18 = vpop.permute.xlu1 %670 }
 0x62b   :  { %v676_v21 = vsel %vm173_vm2, %v671_v18, 0 }
 0x62d   :  { %v1716_v5 = vpop.eup %1715 }
 0x62e   :  { %v513_v6 = vsel %vm173_vm2, %v1716_v5, 0.0  ;;  %v669_v23 = vpop.permute.xlu1 %668 }
 0x62f   :  { %514 = vadd.xlane.f32.xlu0 %v513_v6 }
 0x645   :  { %522 = vrot.lane.b32.xlu0 %v1901_v39, %s1775_s21 }
 0x649   :  { %618 = vrot.lane.b32.xlu0 %v1901_v39, %s1777_s23 }
 0x6b4   :  { %v512_v7 = vpop.xlane.xlu0 %511 }
 0x6b5   :  { %1717 = vrcp.f32 %v512_v7 }
 0x6bc   :  { %v515_v8 = vpop.xlane.xlu0 %514 }
 0x6bd   :  { %1719 = vrcp.f32 %v515_v8 }
 0x6bf   :  { %v1718_v9 = vpop.eup %1717 }
 0x6c0   :  { %v518_v10 = vmul.f32 %v1718_v9, %v1714_v3  ;;  %v523_v11 = vpop.permute.xlu0 %522 }
 0x6c1   :  { %v528_v12 = vsel %vm302_vm4, %v523_v11, 0 }
 0x6c2   :  { %1559 = vmatpush3.bf16.msra.mxu1 %v528_v12  ;;  %v520_v13 = vpack.c.bf16 %v518_v10, %v518_v10 }
 0x6c3   :  { %1570 = vmatprep.subr.bf16.mxu1 %v1769_v15 }
 0x6c4   :  { %v619_v22 = vpop.permute.xlu0 %618 }
 0x6c5   :  { %1561 = vmatmul.mubr.msk.bf16.vlgmr.msra.gmra.mrb[8].mxu1 %vm173_vm2, %v520_v13 }
 0x6c6   :  { %1572 = vmatprep.mubr.msk.bf16.mxu1 %vm1770_vm1, %v1769_v15 }
 0x6c7   :  { %v1720_v16 = vpop.eup %1719 }
 0x6c8   :  { %v519_v17 = vmul.f32 %v1720_v16, %v1716_v5 }
 0x6ca   :  { %v521_v20 = vpack.c.bf16 %v519_v17, %v519_v17 }
 0x6cb   :  { %1571 = vmatpush3.bf16.xpose.msra.mxu1 %v626_v19 }
 0x6cc   :  { %1567 = vmatmul.mubr.msk.bf16.vlgmr.msra.gmra.mrb[20].mxu0 %vm173_vm2, %v521_v20  ;;  %1582 = vmatprep.subr.bf16.mxu1 %v1769_v15 }
 0x6cd   :  { %1577 = vmatpush3.bf16.xpose.msra.mxu0 %v676_v21  ;;  %1578 = vmatprep.mubr.msk.bf16.mxu0 %vm1770_vm1, %v1769_v15 }
 0x6ce   :  { %1588 = vmatprep.subr.bf16.mxu0 %v1769_v15 }
 0x6d2   :  { %1573 = vmatmul.mubr.msk.bf16.vlgmr.msra.gmra.mrb[12].mxu1 %vm173_vm2, %v619_v22 }
 0x6d3   :  { %1584 = vmatprep.mubr.msk.bf16.mxu1 %vm1770_vm1, %v1769_v15 }
 0x6d4   :  { %1579 = vmatmul.mubr.msk.bf16.vlgmr.msra.gmra.mrb[24].mxu0 %vm173_vm2, %v669_v23 }
 0x6d5   :  { %1590 = vmatprep.mubr.msk.bf16.mxu0 %vm1770_vm1, %v1769_v15 }
 0x798   :  { %v1990_v24 = vpop.f32.mrb[8].mxu1 }
 0x799   :  { %v1562_v25 = vpop.f32.mrb[9].mxu1 }
 0x79a   :  { %v567_v26 = vpop.f32.mrb[10].mxu1 }
 0x79b   :  { %v1563_v27 = vpop.f32.mrb[11].mxu1 }
 0x79f   :  { %v1992_v28 = vpop.f32.mrb[20].mxu0 }
 0x7a0   :  { %v1672_v29 = vpack.i.bf16 %v1992_v28, %v1990_v24  ;;  %v1568_v30 = vpop.f32.mrb[21].mxu0 }
 0x7a1   :  { %v615_v31 = vpop.f32.mrb[22].mxu0 }
 0x7a2   :  { %v1569_v33 = vpop.f32.mrb[23].mxu0 }
 0x7a5   :  { %v662_v34 = vpop.f32.mrb[12].mxu1 }
 0x7a6   :  { %v718_v35 = vmul.f32 0.35355338, %v662_v34  ;;  %v1574_v37 = vpop.f32.mrb[13].mxu1 }
 0x7a7   :  { %v665_v38 = vpop.f32.mrb[14].mxu1  ;;  %v712_v40 = vpop.f32.mrb[24].mxu0 }
 0x7a8   :  { %v719_v41 = vmul.f32 0.35355338, %v712_v40  ;;  %v1575_v43 = vpop.f32.mrb[15].mxu1  ;;  %v1580_v44 = vpop.f32.mrb[25].mxu0  ;;  %v720_v45 = vadd.f32 %v718_v35, %v1920_v51 }
 0x7a9   :  { %v715_v46 = vpop.f32.mrb[26].mxu0 }
 0x7aa   :  { %v1581_v47 = vpop.f32.mrb[27].mxu0  ;;  %v722_v48 = vsel %vm173_vm2, %v720_v45, -inf  ;;  %v721_v49 = vadd.f32 %v719_v41, %v1920_v51 }
 0x7ab   :  { %723 = vmax.xlane.f32.xlu0 %v722_v48 }
 0x7ac   :  { %v725_v50 = vsel %vm173_vm2, %v721_v49, -inf }
 0x7ad   :  { %726 = vmax.xlane.f32.xlu1 %v725_v50 }
 0x7be   :  { %794 = vrot.lane.b32.xlu1 %v1903_v42, %s1778_s24 }
 0x7c2   :  { %844 = vrot.lane.b32.xlu1 %v1901_v39, %s1779_s25 }
 0x7c6   :  { %894 = vrot.lane.b32.xlu1 %v1903_v42, %s1779_s25 }
 0x7ca   :  { %892 = vrot.lane.b32.xlu1 %v1903_v42, %s1780_s26 }
 0x838   :  { %v724_v52 = vpop.xlane.xlu0 %723 }
 0x839   :  { %v728_v53 = vsub.f32 %v720_v45, %v724_v52 }
 0x83a   :  { %v727_v54 = vpop.xlane.xlu1 %726 }
 0x83b   :  { %v730_v55 = vmul.f32 1.442695, %v728_v53  ;;  %v729_v56 = vsub.f32 %v721_v49, %v727_v54 }
 0x83d   :  { %1721 = vpow2.f32 %v730_v55  ;;  %v732_v57 = vmul.f32 1.442695, %v729_v56 }
 0x83e   :  { %v795_v58 = vpop.permute.xlu1 %794 }
 0x83f   :  { %1723 = vpow2.f32 %v732_v57  ;;  %v800_v59 = vsel %vm302_vm4, %v795_v58, 0 }
 0x840   :  { %1589 = vmatpush3.bf16.msra.mxu0 %v800_v59 }
 0x841   :  { %1600 = vmatprep.subr.bf16.mxu0 %v1769_v15 }
 0x842   :  { %v845_v7 = vpop.permute.xlu1 %844 }
 0x843   :  { %v850_v13 = vsel %vm173_vm2, %v845_v7, 0 }
 0x846   :  { %v895_v12 = vpop.permute.xlu1 %894 }
 0x847   :  { %v1722_v60 = vpop.eup %1721  ;;  %v900_v16 = vsel %vm173_vm2, %v895_v12, 0 }
 0x848   :  { %v734_v61 = vsel %vm173_vm2, %v1722_v60, 0.0 }
 0x849   :  { %v1724_v62 = vpop.eup %1723  ;;  %735 = vadd.xlane.f32.xlu0 %v734_v61 }
 0x84a   :  { %v737_v63 = vsel %vm173_vm2, %v1724_v62, 0.0  ;;  %v893_v18 = vpop.permute.xlu1 %892 }
 0x84d   :  { %738 = vadd.xlane.f32.xlu0 %v737_v63 }
 0x863   :  { %746 = vrot.lane.b32.xlu0 %v1901_v39, %s1778_s24 }
 0x867   :  { %842 = vrot.lane.b32.xlu0 %v1901_v39, %s1780_s26 }
 0x8d6   :  { %v736_v2 = vpop.xlane.xlu0 %735 }
 0x8d7   :  { %1725 = vrcp.f32 %v736_v2 }
 0x8da   :  { %v739_v3 = vpop.xlane.xlu0 %738 }
 0x8db   :  { %1727 = vrcp.f32 %v739_v3 }
 0x8de   :  { %v747_v4 = vpop.permute.xlu0 %746 }
 0x8df   :  { %v752_v5 = vsel %vm302_vm4, %v747_v4, 0  ;;  %v1689_v4 = vld [vmem:[%s2155_s5] sm:$0xff]  }
 0x8e0   :  { %1583 = vmatpush3.bf16.msra.mxu1 %v752_v5  ;;  %v1690_v5 = vld [vmem:[%s2155_s5 + $0x8] sm:$0xff]  }
 0x8e1   :  { %v1726_v6 = vpop.eup %1725  ;;  %1594 = vmatprep.subr.bf16.mxu1 %v1769_v15 }
 0x8e2   :  { %v742_v8 = vmul.f32 %v1726_v6, %v1722_v60  ;;  %v843_v17 = vpop.permute.xlu0 %842 }
 0x8e4   :  { %v744_v9 = vpack.c.bf16 %v742_v8, %v742_v8 }
 0x8e5   :  { %v1728_v10 = vpop.eup %1727 }
 0x8e6   :  { %v743_v11 = vmul.f32 %v1728_v10, %v1724_v62  ;;  %1585 = vmatmul.mubr.msk.bf16.vlgmr.msra.gmra.mrb[16].mxu1 %vm173_vm2, %v744_v9 }
 0x8e7   :  { %1596 = vmatprep.mubr.msk.bf16.mxu1 %vm1770_vm1, %v1769_v15 }
 0x8e8   :  { %v745_v14 = vpack.c.bf16 %v743_v11, %v743_v11 }
 0x8e9   :  { %1595 = vmatpush3.bf16.xpose.msra.mxu1 %v850_v13 }
 0x8ea   :  { %1591 = vmatmul.mubr.msk.bf16.vlgmr.msra.gmra.mrb[28].mxu0 %vm173_vm2, %v745_v14  ;;  %1606 = vmatprep.subr.bf16.mxu1 %v1769_v15 }
 0x8eb   :  { %1601 = vmatpush3.bf16.xpose.msra.mxu0 %v900_v16  ;;  %1602 = vmatprep.mubr.msk.bf16.mxu0 %vm1770_vm1, %v1769_v15 }
 0x8ec   :  { %1612 = vmatprep.subr.bf16.mxu0 %v1769_v15 }
 0x8f0   :  { %1597 = vmatmul.mubr.msk.bf16.vlgmr.msra.gmra.mrb[20].mxu1 %vm173_vm2, %v843_v17 }
 0x8f1   :  { %1608 = vmatprep.mubr.msk.bf16.mxu1 %vm1770_vm1, %v1769_v15 }
 0x8f2   :  { %1603 = vmatmul.mubr.msk.bf16.vlgmr.msra.gmra.mrb[32].mxu0 %vm173_vm2, %v893_v18 }
 0x8f3   :  { %1614 = vmatprep.mubr.msk.bf16.mxu0 %vm1770_vm1, %v1769_v15 }
 0x9b9   :  { %v788_v19 = vpop.f32.mrb[16].mxu1 }
 0x9ba   :  { %v1586_v20 = vpop.f32.mrb[17].mxu1 }
 0x9bb   :  { %v791_v21 = vpop.f32.mrb[18].mxu1 }
 0x9bc   :  { %v1587_v22 = vpop.f32.mrb[19].mxu1 }
 0x9bd   :  { %v836_v23 = vpop.f32.mrb[28].mxu0 }
 0x9be   :  { %v1677_v25 = vpack.i.bf16 %v836_v23, %v788_v19  ;;  %v1592_v26 = vpop.f32.mrb[29].mxu0 }
 0x9bf   :  { %v839_v27 = vpop.f32.mrb[30].mxu0 }
 0x9c0   :  { %v1593_v30 = vpop.f32.mrb[31].mxu0 }
 0x9c3   :  { %v886_v31 = vpop.f32.mrb[20].mxu1 }
 0x9c4   :  { %v942_v33 = vmul.f32 0.35355338, %v886_v31  ;;  %v1598_v34 = vpop.f32.mrb[21].mxu1 }
 0x9c5   :  { %v889_v35 = vpop.f32.mrb[22].mxu1  ;;  %v936_v37 = vpop.f32.mrb[32].mxu0 }
 0x9c6   :  { %v943_v38 = vmul.f32 0.35355338, %v936_v37  ;;  %v1599_v40 = vpop.f32.mrb[23].mxu1  ;;  %v1604_v41 = vpop.f32.mrb[33].mxu0  ;;  %v944_v43 = vadd.f32 %v942_v33, %v1920_v51  ;;  %v1445_v37 = vld [vmem:[%s2156_s6] ss:$0 sm:$0xff] }
 0x9c7   :  { %v939_v44 = vpop.f32.mrb[34].mxu0  ;;  %s1785_s6 = smov [#allocation2]  }
 0x9c8   :  { %v1605_v45 = vpop.f32.mrb[35].mxu0  ;;  %v946_v46 = vsel %vm173_vm2, %v944_v43, -inf  ;;  %v945_v47 = vadd.f32 %v943_v38, %v1920_v51  ;;  %s1412_s17 = sshll.u32 %s1785_s6, 4  ;;  %s1413_s17 = int_to_ptr.vmem [resolvable:$true] %s1412_s17 }
 0x9c9   :  { %947 = vmax.xlane.f32.xlu0 %v946_v46  ;;  %s1745_s18 = scalar_lea.vmem %s1413_s17, 256  ;;  %p1750_p1 = scmp.lt.s32.totalorder %s1413_s17, %s1413_s17 }
 0x9ca   :  { %v949_v48 = vsel %vm173_vm2, %v945_v47, -inf  ;;  %p1746_p0 = scmp.ne.s32.totalorder %s1413_s17, %s1745_s18  ;;  %p1751_p2 = scmp.lt.s32.totalorder %s1745_s18, %s1745_s18 }
 0x9cb   :  { %950 = vmax.xlane.f32.xlu1 %v949_v48 }
 0x9cc   :  { %p1752_p3 = por %p1751_p2, %p1750_p1 }
 0x9ce   :  { %p1753_p4 = pnand %p1752_p3, %p1746_p0 }
 0x9dc   :  { %1018 = vrot.lane.b32.xlu1 %v1903_v42, %s1781_s27 }
 0x9e0   :  { %1673 = vrot.lane.b32.xlu1 %v1672_v29, %s1782_s28 }
 0x9e4   :  { %1678 = vrot.lane.b32.xlu1 %v1677_v25, %s1783_s0 }
 0xa56   :  { %v948_v49 = vpop.xlane.xlu0 %947 }
 0xa57   :  { %v952_v50 = vsub.f32 %v944_v43, %v948_v49 }
 0xa58   :  { %v951_v52 = vpop.xlane.xlu1 %950 }
 0xa59   :  { %v954_v53 = vmul.f32 1.442695, %v952_v50  ;;  %v953_v51 = vsub.f32 %v945_v47, %v951_v52 }
 0xa5b   :  { %1729 = vpow2.f32 %v954_v53  ;;  %v956_v54 = vmul.f32 1.442695, %v953_v51 }
 0xa5c   :  { %v1019_v55 = vpop.permute.xlu1 %1018 }
 0xa5d   :  { %1731 = vpow2.f32 %v956_v54  ;;  %v1024_v56 = vsel %vm302_vm4, %v1019_v55, 0 }
 0xa5e   :  { %1613 = vmatpush3.bf16.msra.mxu0 %v1024_v56  ;;  %v1691_v56 = vld [vmem:[%s2159_s9] sm:$0xff]  }
 0xa5f   :  { %1626 = vmatprep.subr.bf16.mxu0 %v1769_v15 }
 0xa60   :  { %v1674_v16 = vpop.permute.xlu1 %1673 }
 0xa61   :  { %v1676_v18 = vunpack.i.h.bf16 %v1674_v16  ;;  %v1675_v19 = vunpack.i.l.bf16 %v1674_v16  ;;  %v1700_v16 = vld [vmem:[%s2161_s11 + $0x38] sm:$0xff]  }
 0xa63   :  { %v1091_v23 = vsel %vm173_vm2, %v1956_v36, %v1676_v18  ;;  %v1090_v25 = vsel %vm173_vm2, %v1954_v32, %v1675_v19 }
 0xa64   :  { %v1679_v17 = vpop.permute.xlu1 %1678 }
 0xa65   :  { %v1730_v42 = vpop.eup %1729  ;;  %v1681_v20 = vunpack.i.h.bf16 %v1679_v17  ;;  %v1680_v21 = vunpack.i.l.bf16 %v1679_v17  ;;  %v1451_v17 = vld [vmem:[%s2160_s10] ss:$0 sm:$0xff] }
 0xa66   :  { %v958_v24 = vsel %vm173_vm2, %v1730_v42, 0.0 }
 0xa67   :  { %v1732_v28 = vpop.eup %1731  ;;  %959 = vadd.xlane.f32.xlu0 %v958_v24  ;;  %v1093_v30 = vsel %vm1092_vm5, %v1090_v25, %v1680_v21  ;;  %v1094_v31 = vsel %vm1092_vm5, %v1091_v23, %v1681_v20  ;;  %v1693_v24 = vld [vmem:[%s2161_s11] sm:$0xff]  }
 0xa68   :  { %v961_v29 = vsel %vm173_vm2, %v1732_v28, 0.0 }
 0xa6b   :  { %962 = vadd.xlane.f32.xlu0 %v961_v29 }
 0xa81   :  { %970 = vrot.lane.b32.xlu0 %v1901_v39, %s1781_s27 }
 0xaf4   :  { %v960_v57 = vpop.xlane.xlu0 %959 }
 0xaf5   :  { %1733 = vrcp.f32 %v960_v57 }
 0xaf8   :  { %v963_v58 = vpop.xlane.xlu0 %962 }
 0xaf9   :  { %1735 = vrcp.f32 %v963_v58 }
 0xafc   :  { %v971_v59 = vpop.permute.xlu0 %970 }
 0xafd   :  { %v976_v60 = vsel %vm302_vm4, %v971_v59, 0 }
 0xafe   :  { %1607 = vmatpush3.bf16.msra.mxu1 %v976_v60 }
 0xaff   :  { %v1734_v61 = vpop.eup %1733  ;;  %1618 = vmatprep.subr.bf16.mxu1 %v1769_v15 }
 0xb00   :  { %v966_v62 = vmul.f32 %v1734_v61, %v1730_v42  ;;  %v1692_v42 = vld [vmem:[%s2159_s9 + $0x8] sm:$0xff]  }
 0xb02   :  { %v968_v63 = vpack.c.bf16 %v966_v62, %v966_v62 }
 0xb03   :  { %v1736_v2 = vpop.eup %1735 }
 0xb04   :  { %v967_v3 = vmul.f32 %v1736_v2, %v1732_v28  ;;  %1609 = vmatmul.mubr.msk.bf16.vlgmr.msra.gmra.mrb[24].mxu1 %vm173_vm2, %v968_v63  ;;  %v1694_v28 = vld [vmem:[%s2161_s11 + $0x8] sm:$0xff]   ;;  %v1449_v2 = vld [vmem:[%s2157_s7] ss:$0 sm:$0xff] }
 0xb05   :  { %1622 = vmatprep.mubr.msk.bf16.mxu1 %vm1770_vm1, %v1769_v15  ;;  %1619 = vmatpush3.bf16.msra.mxu1 %v1689_v4 }
 0xb06   :  { %v969_v39 = vpack.c.bf16 %v967_v3, %v967_v3  ;;  %1620 = vmatprep.subr.bf16.mxu1 %v1769_v15 }
 0xb08   :  { %1615 = vmatmul.mubr.msk.bf16.vlgmr.msra.gmra.mrb[36].mxu0 %vm173_vm2, %v969_v39 }
 0xb09   :  { %1630 = vmatprep.mubr.msk.bf16.mxu0 %vm1770_vm1, %v1769_v15  ;;  %1621 = vmatpush3.bf16.msra.mxu1 %v1690_v5  ;;  %v1450_v5 = vld [vmem:[%s2158_s8] ss:$0 sm:$0xff] }
 0xb0a   :  { %1634 = vmatprep.subr.bf16.mxu1 %v1769_v15  ;;  %1627 = vmatpush3.bf16.msra.mxu0 %v1691_v56 }
 0xb0b   :  { %1628 = vmatprep.subr.bf16.mxu0 %v1769_v15 }
 0xb0e   :  { %1629 = vmatpush3.bf16.msra.mxu0 %v1692_v42 }
 0xbd7   :  { %v1012_v6 = vpop.f32.mrb[24].mxu1 }
 0xbd8   :  { %v1610_v7 = vpop.f32.mrb[25].mxu1 }
 0xbd9   :  { %v1015_v8 = vpop.f32.mrb[26].mxu1 }
 0xbda   :  { %v1611_v9 = vpop.f32.mrb[27].mxu1 }
 0xbdb   :  { %v1060_v10 = vpop.f32.mrb[36].mxu0 }
 0xbdc   :  { %v1682_v11 = vpack.i.bf16 %v1060_v10, %v1012_v6  ;;  %v1616_v12 = vpop.f32.mrb[37].mxu0  ;;  %v1695_v10 = vld [vmem:[%s2161_s11 + $0x10] sm:$0xff]  }
 0xbdd   :  { %v1063_v13 = vpop.f32.mrb[38].mxu0  ;;  %v1697_v12 = vld [vmem:[%s2161_s11 + $0x20] sm:$0xff]  }
 0xbde   :  { %1683 = vrot.lane.b32.xlu0 %v1682_v11, %s1784_s15  ;;  %v1617_v14 = vpop.f32.mrb[39].mxu0  ;;  %v1696_v11 = vld [vmem:[%s2161_s11 + $0x18] sm:$0xff]   ;;  %v1698_v13 = vld [vmem:[%s2161_s11 + $0x28] sm:$0xff]  }
 0xbdf   :  { %v1699_v14 = vld [vmem:[%s2161_s11 + $0x30] sm:$0xff]  }
 0xc50   :  { %v1684_v22 = vpop.permute.xlu0 %1683 }
 0xc51   :  { %v1686_v26 = vunpack.i.h.bf16 %v1684_v22  ;;  %v1685_v27 = vunpack.i.l.bf16 %v1684_v22 }
 0xc53   :  { %v1097_v33 = vsel %vm1095_vm6, %v1094_v31, %v1686_v26  ;;  %v1096_v34 = vsel %vm1095_vm6, %v1093_v30, %v1685_v27 }
 0xc54   :  { %v1098_v35 = vpack.c.bf16 %v1097_v33, %v1096_v34 }
 0xc56   :  { %1623 = vmatmul.mubr.msk.bf16.vlgmr.msra.gmra.mrb[28].mxu1 %vm50_vm0, %v1098_v35 }
 0xc57   :  { %1650 = vmatprep.mubr.msk.bf16.mxu1 %vm1770_vm1, %v1769_v15  ;;  %1635 = vmatpush3.bf16.msra.mxu1 %v1693_v24 }
 0xc58   :  { %1636 = vmatprep.subr.bf16.mxu1 %v1769_v15 }
 0xc5b   :  { %1637 = vmatpush3.bf16.msra.mxu1 %v1694_v28 }
 0xc5c   :  { %1638 = vmatprep.subr.bf16.mxu1 %v1769_v15 }
 0xc5f   :  { %1639 = vmatpush3.bf16.msra.mxu1 %v1695_v10 }
 0xc60   :  { %1640 = vmatprep.subr.bf16.mxu1 %v1769_v15 }
 0xc63   :  { %1641 = vmatpush3.bf16.msra.mxu1 %v1696_v11 }
 0xc64   :  { %1642 = vmatprep.subr.bf16.mxu1 %v1769_v15 }
 0xc67   :  { %1643 = vmatpush3.bf16.msra.mxu1 %v1697_v12 }
 0xc68   :  { %1644 = vmatprep.subr.bf16.mxu1 %v1769_v15 }
 0xc6b   :  { %1645 = vmatpush3.bf16.msra.mxu1 %v1698_v13 }
 0xc6c   :  { %1646 = vmatprep.subr.bf16.mxu1 %v1769_v15 }
 0xc6f   :  { %1647 = vmatpush3.bf16.msra.mxu1 %v1699_v14 }
 0xc70   :  { %1648 = vmatprep.subr.bf16.mxu1 %v1769_v15 }
 0xc73   :  { %1649 = vmatpush3.bf16.msra.mxu1 %v1700_v16 }
 0xd29   :  { %v1159_v36 = vpop.f32.mrb[28].mxu1 }
 0xd2a   :  { %v1160_v38 = vadd.f32 %v1445_v37, %v1159_v36  ;;  %v1624_v40 = vpop.f32.mrb[29].mxu1 }
 0xd2b   :  { %v1162_v32 = vpop.f32.mrb[30].mxu1 }
 0xd2c   :  { %v2069_v41 = vadd.f32 %v1160_v38, %v1860_v0  ;;  %v1163_v43 = vadd.f32 %v1445_v37, %v1162_v32  ;;  %v1625_v44 = vpop.f32.mrb[31].mxu1  ;;  %v1455_v38 = vld [vmem:[%s2162_s12] ss:$0 sm:$0xff] }
 0xd2e   :  { %v2072_v45 = vadd.f32 %v1163_v43, %v1865_v1  ;;  %v1170_v46 = vsel %vm50_vm0, %v2069_v41, 0.0 }
 0xd2f   :  { %1171 = vadd.xlane.f32.xlu1 %v1170_v46 }
 0xd30   :  { %v1173_v47 = vsel %vm50_vm0, %v2072_v45, 0.0 }
 0xd31   :  { %1174 = vadd.xlane.f32.xlu0 %v1173_v47 }
 0xdbc   :  { %v1172_v48 = vpop.xlane.xlu1 %1171 }
 0xdbd   :  { %v1176_v49 = vmul.f32 0.03125, %v1172_v48 }
 0xdbe   :  { %v1175_v50 = vpop.xlane.xlu0 %1174 }
 0xdbf   :  { %v1178_v52 = vsub.f32 %v2069_v41, %v1176_v49  ;;  %v1177_v0 = vmul.f32 0.03125, %v1175_v50 }
 0xdc1   :  { %v1179_v53 = vsub.f32 %v2072_v45, %v1177_v0  ;;  %v1180_v51 = vmul.f32 %v1178_v52, %v1178_v52 }
 0xdc3   :  { %v1182_v1 = vsel %vm50_vm0, %v1180_v51, 0.0  ;;  %v1181_v54 = vmul.f32 %v1179_v53, %v1179_v53 }
 0xdc4   :  { %1183 = vadd.xlane.f32.xlu0 %v1182_v1 }
 0xdc5   :  { %v1185_v55 = vsel %vm50_vm0, %v1181_v54, 0.0 }
 0xdc8   :  { %1186 = vadd.xlane.f32.xlu0 %v1185_v55 }
 0xe51   :  { %v1184_v29 = vpop.xlane.xlu0 %1183 }
 0xe52   :  { %v1188_v57 = vmul.f32 0.03125, %v1184_v29 }
 0xe54   :  { %v1190_v58 = vadd.f32 1e-05, %v1188_v57 }
 0xe55   :  { %v1187_v59 = vpop.xlane.xlu0 %1186 }
 0xe56   :  { %1737 = vrsqrt.f32 %v1190_v58  ;;  %v1189_v60 = vmul.f32 0.03125, %v1187_v59 }
 0xe58   :  { %v1191_v61 = vadd.f32 1e-05, %v1189_v60 }
 0xe5a   :  { %1739 = vrsqrt.f32 %v1191_v61 }
 0xe60   :  { %v1738_v62 = vpop.eup %1737 }
 0xe61   :  { %v1194_v63 = vmul.f32 %v1738_v62, %v1178_v52 }
 0xe63   :  { %v1202_v39 = vmul.f32 %v1449_v2, %v1194_v63 }
 0xe64   :  { %v1740_v3 = vpop.eup %1739 }
 0xe65   :  { %v1195_v4 = vmul.f32 %v1740_v3, %v1179_v53  ;;  %v1210_v7 = vadd.f32 %v1450_v5, %v1202_v39 }
 0xe67   :  { %v1203_v6 = vmul.f32 %v1449_v2, %v1195_v4 }
 0xe69   :  { %v1211_v8 = vadd.f32 %v1450_v5, %v1203_v6 }
 0xe6b   :  { %v1212_v9 = vpack.c.bf16 %v1211_v8, %v1210_v7 }
 0xe6d   :  { %1631 = vmatmul.mubr.msk.bf16.vlgmr.msra.gmra.mrb[40].mxu0 %vm50_vm0, %v1212_v9 }
 0xf40   :  { %v1273_v18 = vpop.f32.mrb[40].mxu0 }
 0xf41   :  { %v1274_v19 = vadd.f32 %v1451_v17, %v1273_v18  ;;  %v1632_v20 = vpop.f32.mrb[41].mxu0 }
 0xf42   :  { %v1276_v21 = vpop.f32.mrb[42].mxu0 }
 0xf43   :  { %v1282_v22 = vmul.f32 0.70710677, %v1274_v19  ;;  %v1277_v23 = vadd.f32 %v1451_v17, %v1276_v21  ;;  %v1633_v25 = vpop.f32.mrb[43].mxu0  ;;  %v1280_v31 = vmul.f32 0.5, %v1274_v19 }
 0xf45   :  { %1741 = verf.f32 %v1282_v22  ;;  %v1283_v26 = vmul.f32 0.70710677, %v1277_v23  ;;  %v1281_v33 = vmul.f32 0.5, %v1277_v23 }
 0xf47   :  { %1743 = verf.f32 %v1283_v26 }
 0xf4f   :  { %v1742_v15 = vpop.eup %1741 }
 0xf50   :  { %v1286_v27 = vadd.f32 1.0, %v1742_v15 }
 0xf51   :  { %v1744_v30 = vpop.eup %1743 }
 0xf52   :  { %v1287_v34 = vadd.f32 1.0, %v1744_v30  ;;  %v1288_v35 = vmul.f32 %v1286_v27, %v1280_v31 }
 0xf54   :  { %v1289_v37 = vmul.f32 %v1287_v34, %v1281_v33 }
 0xf56   :  { %v1290_v36 = vpack.c.bf16 %v1289_v37, %v1288_v35 }
 0xf58   :  { %1651 = vmatmul.mubr.bf16.vlgmr.msra.gmra.mrb[32].mxu1 %v1290_v36 }
0x102b   :  { %v1396_v40 = vpop.f32.mrb[32].mxu1 }
0x102c   :  { %v1397_v32 = vadd.f32 %v1455_v38, %v1396_v40  ;;  %v1652_v43 = vpop.f32.mrb[33].mxu1 }
0x102d   :  { %v1399_v44 = vpop.f32.mrb[34].mxu1 }
0x102e   :  { %v1403_v46 = vadd.f32 %v1397_v32, %v2069_v41  ;;  %v1400_v47 = vadd.f32 %v1455_v38, %v1399_v44  ;;  %v1653_v48 = vpop.f32.mrb[35].mxu1 }
0x1030   :  { %1405 = vst.msk [vmem:[#allocation2] sm:$0xff] %vm50_vm0, %v1403_v46  ;;  %v1404_v49 = vadd.f32 %v1400_v47, %v2072_v45 }
0x1032   :  { %1406 = vst.msk [vmem:[#allocation2 + $0x8] sm:$0xff] %vm50_vm0, %v1404_v49 }
0x1033   :  { %1756 = shalt.err (!%p1753_p4)
}
0x1034   :  { %s1757_s1 = scalar_lea.hbm %s2163_s13, 256 }
0x1035   :  { %p1758_p5 = scmp.ne.s32.totalorder %s2163_s13, %s1757_s1  ;;  %p1761_p6 = scmp.lt.u32.totalorder %s1757_s1, %s2163_s13 }
0x1037   :  { %p1763_p7 = pnand %p1761_p6, %p1758_p5 }
0x1039   :  { %1766 = shalt.err (!%p1763_p7)
}
0x103a   :  { %s1786_s21 = smov 128  }
0x103b   :  { %1418 = dma.vmem_to_hbm [thread:$0]  %s1413_s17, 256, %s2163_s13, [#allocation3], %s1786_s21, %s1786_s21, %s1782_s28  }
0x103c   :  { %1767 = dma.done.wait [#allocation3], 256  }
0x103d   :  { %1768 = vsyncadd [#allocation3], 4294967040 }
0x103e   :  { %1422 = vsyncpa [#allocation3], 1 }

</bundles_post_ra>
